<compile_context>
chip_gen: v6e
topology: v6e:2x2x1
jax: 0.10.0
libtpu: 0.0.40
codegen_flags: <defaults>
</compile_context>

<pallas_src>
import math
import functools

import jax
import jax.numpy as jnp
from jax import lax
from jax.experimental import pallas as pl
from jax.experimental.pallas import tpu as pltpu


# ---------------------------------------------------------------------------
# Helpers
# ---------------------------------------------------------------------------

def _round_up(x, m):
    return ((x + m - 1) // m) * m


def _tile_and_pad(dim, target):
    """dim <= target -> single full-dim block; else tile=target, pad to multiple."""
    if dim <= target:
        return dim, dim
    return target, _round_up(dim, target)


@functools.lru_cache(maxsize=None)
def _vmem_limit_bytes():
    """Scoped-VMEM cap: ~75% of per-core VMEM (v7x ~48 MiB, v5e/v6e ~96 MiB)."""
    try:
        cap = int(pltpu.get_tpu_info().vmem_capacity_bytes)
    except Exception:  # pragma: no cover - conservative fallback
        cap = 64 * 1024 * 1024
    return min((cap * 3) // 4, 96 * 1024 * 1024)


# ---------------------------------------------------------------------------
# Tiled linear kernel:  y = x @ w + b
# ---------------------------------------------------------------------------

def _linear_kernel(x_ref, w_ref, b_ref, o_ref, acc_ref):
    k = pl.program_id(2)

    @pl.when(k == 0)
    def _():
        acc_ref[...] = jnp.zeros(acc_ref.shape, acc_ref.dtype)

    acc_ref[...] += jnp.dot(x_ref[...], w_ref[...],
                            preferred_element_type=jnp.float32)

    @pl.when(k == pl.num_programs(2) - 1)
    def _():
        o_ref[...] = (acc_ref[...]
                      + b_ref[...].astype(jnp.float32)).astype(o_ref.dtype)


def pallas_linear(x2d, w, b, *, tm=512, tn=1024, tk=512):
    """y = x2d @ w + b with a K accumulation loop and M/N parallel tiling."""
    M, K = x2d.shape
    Kw, N = w.shape
    assert K == Kw
    tm, Mp = _tile_and_pad(M, tm)
    tk, Kp = _tile_and_pad(K, tk)
    tn, Np = _tile_and_pad(N, tn)

    # TODO(synk): ragged M/N/K falls back to an XLA pad + slice pass; standard
    # transformer dims (multiples of 128/256) never hit this path.
    xp = x2d if (Mp == M and Kp == K) else jnp.pad(x2d, ((0, Mp - M), (0, Kp - K)))
    wp = w if (Kp == K and Np == N) else jnp.pad(w, ((0, Kp - K), (0, Np - N)))
    bp = b.reshape(1, N)
    if Np != N:
        bp = jnp.pad(bp, ((0, 0), (0, Np - N)))

    out = pl.pallas_call(
        _linear_kernel,
        out_shape=jax.ShapeDtypeStruct((Mp, Np), x2d.dtype),
        grid_spec=pltpu.PrefetchScalarGridSpec(
            num_scalar_prefetch=0,
            grid=(Mp // tm, Np // tn, Kp // tk),
            in_specs=[
                pl.BlockSpec((tm, tk), lambda i, j, k: (i, k)),
                pl.BlockSpec((tk, tn), lambda i, j, k: (k, j)),
                pl.BlockSpec((1, tn), lambda i, j, k: (0, j)),
            ],
            out_specs=pl.BlockSpec((tm, tn), lambda i, j, k: (i, j)),
            scratch_shapes=[pltpu.VMEM((tm, tn), jnp.float32)],
        ),
        compiler_params=pltpu.CompilerParams(
            dimension_semantics=("parallel", "parallel", "arbitrary"),
            vmem_limit_bytes=_vmem_limit_bytes()),
    )(xp, wp, bp)

    if (Mp, Np) != (M, N):
        out = out[:M, :N]
    return out


# ---------------------------------------------------------------------------
# Flash-style attention kernel over head-major q/k/v (B, H, S, Dh)
# ---------------------------------------------------------------------------

def _flash_attn_kernel(q_ref, k_ref, v_ref, o_ref,
                       qs_ref, m_ref, l_ref, acc_ref,
                       *, scale, num_heads, head_dim, kv_block, seq_len, padded):
    # q_ref: (H, tq, Dh)   k_ref/v_ref: (H, tkv, Dh)   o_ref: (tq, H*Dh)
    # scratch: qs (H, tq, Dh) compute dtype, m/l (H, tq, 1) f32, acc (H, tq, Dh) f32
    kv_i = pl.program_id(2)

    @pl.when(kv_i == 0)
    def _():
        # Scale Q once per (batch, q-block): removes H*(tq*Dh) VPU multiplies
        # from every kv step.
        qs_ref[...] = q_ref[...] * scale
        m_ref[...] = jnp.full(m_ref.shape, -jnp.inf, dtype=m_ref.dtype)
        l_ref[...] = jnp.zeros(l_ref.shape, dtype=l_ref.dtype)
        acc_ref[...] = jnp.zeros(acc_ref.shape, dtype=acc_ref.dtype)

    def head_step(h):
        q_h = qs_ref[h]                      # (tq, Dh)  cheap leading-axis index
        k_h = k_ref[h]                       # (tkv, Dh)
        # Scores: contract head_dim directly (A @ B^T form, no K transpose).
        s = lax.dot_general(q_h, k_h,
                            dimension_numbers=(((1,), (1,)), ((), ())),
                            preferred_element_type=jnp.float32)   # (tq, tkv)
        if padded:
            pos = kv_i * kv_block + lax.broadcasted_iota(jnp.int32, s.shape, 1)
            s = jnp.where(pos < seq_len, s, -1e30)
        m_prev = m_ref[h]
        m_new = jnp.maximum(m_prev, jnp.max(s, axis=-1, keepdims=True))
        alpha = jnp.exp(m_prev - m_new)
        p = jnp.exp(s - m_new)               # (tq, tkv) f32
        l_ref[h] = alpha * l_ref[h] + jnp.sum(p, axis=-1, keepdims=True)
        acc_ref[h] = alpha * acc_ref[h] + jnp.dot(
            p.astype(v_ref.dtype), v_ref[h], preferred_element_type=jnp.float32)
        m_ref[h] = m_new

    if num_heads <= 8:
        for h in range(num_heads):           # small head counts: full unroll
            head_step(h)
    else:
        def body(h, carry):                  # bound code size / vreg pressure
            head_step(h)
            return carry
        lax.fori_loop(0, num_heads, body, 0)

    @pl.when(kv_i == pl.num_programs(2) - 1)
    def _():
        # Exact normalization (finalize runs once per q-block, so the division
        # cost is negligible); write one lane-dense (tq, H*Dh) slab.
        if head_dim % 128 == 0:
            for h in range(num_heads):
                o_ref[:, h * head_dim:(h + 1) * head_dim] = (
                    acc_ref[h] / l_ref[h]).astype(o_ref.dtype)
        else:
            parts = [acc_ref[h] / l_ref[h] for h in range(num_heads)]
            o_ref[...] = jnp.concatenate(parts, axis=-1).astype(o_ref.dtype)


def pallas_mha_attention(q, k, v, softmax_scale, *, q_block=256, kv_block=512):
    """q/k/v: head-major (B, H, S, Dh) -> context (B, S, H*Dh); softmax in f32."""
    B, H, S, Dh = q.shape
    D = H * Dh

    tq = S if S <= q_block else q_block
    tkv = S if S <= kv_block else kv_block
    if (S % tq) or (S % tkv):
        # Ragged S: pad up to a multiple of the kv block (a multiple of the q
        # block) and mask the padded keys inside the kernel.
        tq = q_block
        tkv = max(tq, (kv_block // tq) * tq)
        Sp = _round_up(S, tkv)
    else:
        Sp = S
    padded = Sp != S
    if padded:
        pad = ((0, 0), (0, 0), (0, Sp - S), (0, 0))
        q, k, v = jnp.pad(q, pad), jnp.pad(k, pad), jnp.pad(v, pad)

    grid = (B, Sp // tq, Sp // tkv)
    kern = functools.partial(
        _flash_attn_kernel, scale=softmax_scale, num_heads=H, head_dim=Dh,
        kv_block=tkv, seq_len=S, padded=padded)

    out = pl.pallas_call(
        kern,
        out_shape=jax.ShapeDtypeStruct((B, Sp, D), q.dtype),
        grid_spec=pltpu.PrefetchScalarGridSpec(
            num_scalar_prefetch=0,
            grid=grid,
            in_specs=[
                pl.BlockSpec((None, H, tq, Dh), lambda b, qi, kv: (b, 0, qi, 0)),
                pl.BlockSpec((None, H, tkv, Dh), lambda b, qi, kv: (b, 0, kv, 0)),
                pl.BlockSpec((None, H, tkv, Dh), lambda b, qi, kv: (b, 0, kv, 0)),
            ],
            out_specs=pl.BlockSpec((None, tq, D), lambda b, qi, kv: (b, qi, 0)),
            scratch_shapes=[
                pltpu.VMEM((H, tq, Dh), q.dtype),      # scaled Q (hoisted)
                pltpu.VMEM((H, tq, 1), jnp.float32),   # running max
                pltpu.VMEM((H, tq, 1), jnp.float32),   # running denominator
                pltpu.VMEM((H, tq, Dh), jnp.float32),  # running accumulator
            ],
        ),
        compiler_params=pltpu.CompilerParams(
            dimension_semantics=("parallel", "parallel", "arbitrary"),
            vmem_limit_bytes=_vmem_limit_bytes()),
    )(q, k, v)

    if padded:
        out = out[:, :S, :]
    return out


# ---------------------------------------------------------------------------
# MHA forward (default self-attention path)
# ---------------------------------------------------------------------------

def mha_forward(x, params, num_heads, compute_dtype=jnp.bfloat16):
    B, S, D = x.shape
    assert D % num_heads == 0
    Dh = D // num_heads
    softmax_scale = 1.0 / math.sqrt(Dh)
    dt = x.dtype if compute_dtype is None else compute_dtype

    # QKV projection: bf16 MXU operands, f32 accumulation, f32 bias.
    x2d = x.reshape(B * S, D).astype(dt)
    qkv = pallas_linear(x2d, params["Wqkv_w"].astype(dt), params["Wqkv_b"])
    qkv = qkv.reshape(B, S, 3, num_heads, Dh)     # '(three h d)' packing

    # One-time head-major repack: (B,S,3,H,Dh) -> q/k/v (B,H,S,Dh).  Makes the
    # attention kernel's per-head slices leading-axis indices and the K/V DMAs
    # contiguous along S.
    qkv_hm = jnp.transpose(qkv, (2, 0, 3, 1, 4))
    q, k, v = qkv_hm[0], qkv_hm[1], qkv_hm[2]

    ctx = pallas_mha_attention(q, k, v, softmax_scale)        # (B, S, D)

    # Output projection; ctx is already lane-dense (..., H*Dh): no transpose.
    out = pallas_linear(ctx.reshape(B * S, D),
                        params["out_w"].astype(dt), params["out_b"])
    return out.reshape(B, S, D).astype(x.dtype)


# ---------------------------------------------------------------------------
# Pure-JAX reference (mirrors the torch SelfAttention path, f32 throughout)
# ---------------------------------------------------------------------------

def mha_reference(x, params, num_heads):
    B, S, D = x.shape
    Hd = D // num_heads
    scale = 1.0 / math.sqrt(Hd)
    qkv = x @ params["Wqkv_w"] + params["Wqkv_b"]
    qkv = qkv.reshape(B, S, 3, num_heads, Hd)
    q, k, v = qkv[:, :, 0], qkv[:, :, 1], qkv[:, :, 2]
    scores = jnp.einsum("bthd,bshd->bhts", q, k * scale)
    attn = jax.nn.softmax(scores, axis=-1)
    ctx = jnp.einsum("bhts,bshd->bthd", attn, v).reshape(B, S, D)
    return ctx @ params["out_w"] + params["out_b"]


# ---------------------------------------------------------------------------
# Deterministic parameter init (nn.Linear-style uniform(-1/sqrt(fan_in), ...))
# ---------------------------------------------------------------------------

def init_params(key, embed_dim):
    qkv_dim = 3 * embed_dim
    k1, k2, k3, k4 = jax.random.split(key, 4)
    bound = 1.0 / math.sqrt(embed_dim)
    return {
        "Wqkv_w": jax.random.uniform(k1, (embed_dim, qkv_dim), jnp.float32,
                                     -bound, bound),
        "Wqkv_b": jax.random.uniform(k2, (qkv_dim,), jnp.float32, -bound, bound),
        "out_w": jax.random.uniform(k3, (embed_dim, embed_dim), jnp.float32,
                                    -bound, bound),
        "out_b": jax.random.uniform(k4, (embed_dim,), jnp.float32, -bound, bound),
    }


if __name__ == "__main__":
    batch, seqlen, embed_dim, num_heads = 2, 8, 32, 4

    key = jax.random.PRNGKey(0)
    kx, kp = jax.random.split(key)
    x = jax.random.normal(kx, (batch, seqlen, embed_dim), jnp.float32)
    params = init_params(kp, embed_dim)

    ref = mha_reference(x, params, num_heads)

    # f32 compute path: tight numerical check of the kernel math.
    fwd_f32 = jax.jit(functools.partial(mha_forward, num_heads=num_heads,
                                        compute_dtype=jnp.float32))
    out_f32 = jax.block_until_ready(fwd_f32(x, params))
    assert out_f32.shape == (batch, seqlen, embed_dim)
    err_f32 = float(jnp.max(jnp.abs(out_f32 - ref)))
    assert err_f32 < 5e-3, f"f32 path: max abs diff = {err_f32}"

    # Default bf16-operand path (f32 accumulation) — the fast MXU configuration.
    fwd_bf16 = jax.jit(functools.partial(mha_forward, num_heads=num_heads))
    out_bf16 = jax.block_until_ready(fwd_bf16(x, params))
    err_bf16 = float(jnp.max(jnp.abs(out_bf16 - ref)))
    assert err_bf16 < 5e-2, f"bf16 path: max abs diff = {err_bf16}"

    # TODO(synk): dwconv / rotary / cross-attn (MQA-GQA) / kv-cache inference /
    # dropout / key_padding_mask branches are not exercised by the default
    # constructor args and are not implemented.
    print("KERNEL_OK")
</pallas_src>

<mosaic_0001>
module attributes {stable_mosaic.version = 11 : i64} {
  func.func @_linear_kernel(%arg0: i32, %arg1: i32, %arg2: i32, %arg3: memref<16x32xf32, #tpu.memory_space<vmem>>, %arg4: memref<32x96xf32, #tpu.memory_space<vmem>>, %arg5: memref<1x96xf32, #tpu.memory_space<vmem>>, %arg6: memref<16x96xf32, #tpu.memory_space<vmem>>, %arg7: memref<16x96xf32, #tpu.memory_space<vmem>>) attributes {dimension_semantics = [#tpu.dimension_semantics<parallel>, #tpu.dimension_semantics<parallel>, #tpu.dimension_semantics<arbitrary>], iteration_bounds = array<i64: 1, 1, 1>, scalar_prefetch = 0 : i64, scratch_operands = 1 : i64, tpu.core_type = #tpu.core_type<tc>, window_params = [{transform_indices = @transform_0, window_bounds = array<i64: 16, 32>}, {transform_indices = @transform_1, window_bounds = array<i64: 32, 96>}, {transform_indices = @transform_2, window_bounds = array<i64: 1, 96>}, {transform_indices = @transform_3, window_bounds = array<i64: 16, 96>}]} {
    %c0_i32 = arith.constant 0 : i32
    %0 = arith.cmpi eq, %arg2, %c0_i32 : i32
    %1 = arith.extui %0 : i1 to i32
    %c0_i32_0 = arith.constant 0 : i32
    %2 = arith.cmpi ne, %1, %c0_i32_0 : i32
    scf.if %2 {
      %cst_10 = arith.constant 0.000000e+00 : f32
      %12 = vector.broadcast %cst_10 : f32 to vector<16x96xf32>
      %c0_11 = arith.constant 0 : index
      %c0_12 = arith.constant 0 : index
      %13 = vector.load %arg7[%c0_11, %c0_12] : memref<16x96xf32, #tpu.memory_space<vmem>>, vector<16x96xf32>
      tpu.vector_store %arg7[%c0_11, %c0_12], %12 {strides = array<i32>} : memref<16x96xf32, #tpu.memory_space<vmem>>, vector<16x96xf32>,
    } else {
    }
    %c0 = arith.constant 0 : index
    %c0_1 = arith.constant 0 : index
    %3 = vector.load %arg7[%c0, %c0_1] : memref<16x96xf32, #tpu.memory_space<vmem>>, vector<16x96xf32>
    %c0_2 = arith.constant 0 : index
    %c0_3 = arith.constant 0 : index
    %4 = vector.load %arg3[%c0_2, %c0_3] : memref<16x32xf32, #tpu.memory_space<vmem>>, vector<16x32xf32>
    %c0_4 = arith.constant 0 : index
    %c0_5 = arith.constant 0 : index
    %5 = vector.load %arg4[%c0_4, %c0_5] : memref<32x96xf32, #tpu.memory_space<vmem>>, vector<32x96xf32>
    %cst = arith.constant dense<0.000000e+00> : vector<16x96xf32>
    %6 = tpu.matmul %4, %5, %cst {dimension_numbers = #tpu.dot_dimension_numbers<[1], [0], [0], [1], [0, 0, 1, 1], [], []>} : vector<16x32xf32>, vector<32x96xf32>, vector<16x96xf32> -> vector<16x96xf32>
    %7 = arith.addf %3, %6 : vector<16x96xf32>
    %c0_6 = arith.constant 0 : index
    %c0_7 = arith.constant 0 : index
    %8 = vector.load %arg7[%c0_6, %c0_7] : memref<16x96xf32, #tpu.memory_space<vmem>>, vector<16x96xf32>
    tpu.vector_store %arg7[%c0_6, %c0_7], %7 {strides = array<i32>} : memref<16x96xf32, #tpu.memory_space<vmem>>, vector<16x96xf32>,
    %c0_i32_8 = arith.constant 0 : i32
    %9 = arith.cmpi eq, %arg2, %c0_i32_8 : i32
    %10 = arith.extui %9 : i1 to i32
    %c0_i32_9 = arith.constant 0 : i32
    %11 = arith.cmpi ne, %10, %c0_i32_9 : i32
    scf.if %11 {
      %c0_10 = arith.constant 0 : index
      %c0_11 = arith.constant 0 : index
      %12 = vector.load %arg7[%c0_10, %c0_11] : memref<16x96xf32, #tpu.memory_space<vmem>>, vector<16x96xf32>
      %c0_12 = arith.constant 0 : index
      %c0_13 = arith.constant 0 : index
      %13 = vector.load %arg5[%c0_12, %c0_13] : memref<1x96xf32, #tpu.memory_space<vmem>>, vector<1x96xf32>
      %14 = vector.broadcast %13 : vector<1x96xf32> to vector<16x96xf32>
      %15 = arith.addf %12, %14 : vector<16x96xf32>
      %c0_14 = arith.constant 0 : index
      %c0_15 = arith.constant 0 : index
      %16 = vector.load %arg6[%c0_14, %c0_15] : memref<16x96xf32, #tpu.memory_space<vmem>>, vector<16x96xf32>
      tpu.vector_store %arg6[%c0_14, %c0_15], %15 {strides = array<i32>} : memref<16x96xf32, #tpu.memory_space<vmem>>, vector<16x96xf32>,
    } else {
    }
    return
  }
  func.func @transform_0(%arg0: i32, %arg1: i32, %arg2: i32) -> (i32, i32) {
    %c0_i32 = arith.constant 0 : i32
    return %arg0, %arg2 : i32, i32
  }
  func.func @transform_1(%arg0: i32, %arg1: i32, %arg2: i32) -> (i32, i32) {
    %c0_i32 = arith.constant 0 : i32
    return %arg2, %arg1 : i32, i32
  }
  func.func @transform_2(%arg0: i32, %arg1: i32, %arg2: i32) -> (i32, i32) {
    %c0_i32 = arith.constant 0 : i32
    %c0_i32_0 = arith.constant 0 : i32
    return %c0_i32, %arg1 : i32, i32
  }
  func.func @transform_3(%arg0: i32, %arg1: i32, %arg2: i32) -> (i32, i32) {
    %c0_i32 = arith.constant 0 : i32
    return %arg0, %arg1 : i32, i32
  }
}

module attributes {stable_mosaic.version = 11 : i64} {
  func.func @_linear_kernel(%arg0: i32, %arg1: i32, %arg2: i32, %arg3: memref<16x32xf32, #tpu.memory_space<vmem>>, %arg4: memref<32x32xf32, #tpu.memory_space<vmem>>, %arg5: memref<1x32xf32, #tpu.memory_space<vmem>>, %arg6: memref<16x32xf32, #tpu.memory_space<vmem>>, %arg7: memref<16x32xf32, #tpu.memory_space<vmem>>) attributes {dimension_semantics = [#tpu.dimension_semantics<parallel>, #tpu.dimension_semantics<parallel>, #tpu.dimension_semantics<arbitrary>], iteration_bounds = array<i64: 1, 1, 1>, scalar_prefetch = 0 : i64, scratch_operands = 1 : i64, tpu.core_type = #tpu.core_type<tc>, window_params = [{transform_indices = @transform_0, window_bounds = array<i64: 16, 32>}, {transform_indices = @transform_1, window_bounds = array<i64: 32, 32>}, {transform_indices = @transform_2, window_bounds = array<i64: 1, 32>}, {transform_indices = @transform_3, window_bounds = array<i64: 16, 32>}]} {
    %c0_i32 = arith.constant 0 : i32
    %0 = arith.cmpi eq, %arg2, %c0_i32 : i32
    %1 = arith.extui %0 : i1 to i32
    %c0_i32_0 = arith.constant 0 : i32
    %2 = arith.cmpi ne, %1, %c0_i32_0 : i32
    scf.if %2 {
      %cst_10 = arith.constant 0.000000e+00 : f32
      %12 = vector.broadcast %cst_10 : f32 to vector<16x32xf32>
      %c0_11 = arith.constant 0 : index
      %c0_12 = arith.constant 0 : index
      %13 = vector.load %arg7[%c0_11, %c0_12] : memref<16x32xf32, #tpu.memory_space<vmem>>, vector<16x32xf32>
      tpu.vector_store %arg7[%c0_11, %c0_12], %12 {strides = array<i32>} : memref<16x32xf32, #tpu.memory_space<vmem>>, vector<16x32xf32>,
    } else {
    }
    %c0 = arith.constant 0 : index
    %c0_1 = arith.constant 0 : index
    %3 = vector.load %arg7[%c0, %c0_1] : memref<16x32xf32, #tpu.memory_space<vmem>>, vector<16x32xf32>
    %c0_2 = arith.constant 0 : index
    %c0_3 = arith.constant 0 : index
    %4 = vector.load %arg3[%c0_2, %c0_3] : memref<16x32xf32, #tpu.memory_space<vmem>>, vector<16x32xf32>
    %c0_4 = arith.constant 0 : index
    %c0_5 = arith.constant 0 : index
    %5 = vector.load %arg4[%c0_4, %c0_5] : memref<32x32xf32, #tpu.memory_space<vmem>>, vector<32x32xf32>
    %cst = arith.constant dense<0.000000e+00> : vector<16x32xf32>
    %6 = tpu.matmul %4, %5, %cst {dimension_numbers = #tpu.dot_dimension_numbers<[1], [0], [0], [1], [0, 0, 1, 1], [], []>} : vector<16x32xf32>, vector<32x32xf32>, vector<16x32xf32> -> vector<16x32xf32>
    %7 = arith.addf %3, %6 : vector<16x32xf32>
    %c0_6 = arith.constant 0 : index
    %c0_7 = arith.constant 0 : index
    %8 = vector.load %arg7[%c0_6, %c0_7] : memref<16x32xf32, #tpu.memory_space<vmem>>, vector<16x32xf32>
    tpu.vector_store %arg7[%c0_6, %c0_7], %7 {strides = array<i32>} : memref<16x32xf32, #tpu.memory_space<vmem>>, vector<16x32xf32>,
    %c0_i32_8 = arith.constant 0 : i32
    %9 = arith.cmpi eq, %arg2, %c0_i32_8 : i32
    %10 = arith.extui %9 : i1 to i32
    %c0_i32_9 = arith.constant 0 : i32
    %11 = arith.cmpi ne, %10, %c0_i32_9 : i32
    scf.if %11 {
      %c0_10 = arith.constant 0 : index
      %c0_11 = arith.constant 0 : index
      %12 = vector.load %arg7[%c0_10, %c0_11] : memref<16x32xf32, #tpu.memory_space<vmem>>, vector<16x32xf32>
      %c0_12 = arith.constant 0 : index
      %c0_13 = arith.constant 0 : index
      %13 = vector.load %arg5[%c0_12, %c0_13] : memref<1x32xf32, #tpu.memory_space<vmem>>, vector<1x32xf32>
      %14 = vector.broadcast %13 : vector<1x32xf32> to vector<16x32xf32>
      %15 = arith.addf %12, %14 : vector<16x32xf32>
      %c0_14 = arith.constant 0 : index
      %c0_15 = arith.constant 0 : index
      %16 = vector.load %arg6[%c0_14, %c0_15] : memref<16x32xf32, #tpu.memory_space<vmem>>, vector<16x32xf32>
      tpu.vector_store %arg6[%c0_14, %c0_15], %15 {strides = array<i32>} : memref<16x32xf32, #tpu.memory_space<vmem>>, vector<16x32xf32>,
    } else {
    }
    return
  }
  func.func @transform_0(%arg0: i32, %arg1: i32, %arg2: i32) -> (i32, i32) {
    %c0_i32 = arith.constant 0 : i32
    return %arg0, %arg2 : i32, i32
  }
  func.func @transform_1(%arg0: i32, %arg1: i32, %arg2: i32) -> (i32, i32) {
    %c0_i32 = arith.constant 0 : i32
    return %arg2, %arg1 : i32, i32
  }
  func.func @transform_2(%arg0: i32, %arg1: i32, %arg2: i32) -> (i32, i32) {
    %c0_i32 = arith.constant 0 : i32
    %c0_i32_0 = arith.constant 0 : i32
    return %c0_i32, %arg1 : i32, i32
  }
  func.func @transform_3(%arg0: i32, %arg1: i32, %arg2: i32) -> (i32, i32) {
    %c0_i32 = arith.constant 0 : i32
    return %arg0, %arg1 : i32, i32
  }
}

module attributes {stable_mosaic.version = 11 : i64} {
  func.func @_flash_attn_kernel(%arg0: i32, %arg1: i32, %arg2: i32, %arg3: memref<1x4x8x8xf32, #tpu.memory_space<vmem>>, %arg4: memref<1x4x8x8xf32, #tpu.memory_space<vmem>>, %arg5: memref<1x4x8x8xf32, #tpu.memory_space<vmem>>, %arg6: memref<1x8x32xf32, #tpu.memory_space<vmem>>, %arg7: memref<4x8x8xf32, #tpu.memory_space<vmem>>, %arg8: memref<4x8x1xf32, #tpu.memory_space<vmem>>, %arg9: memref<4x8x1xf32, #tpu.memory_space<vmem>>, %arg10: memref<4x8x8xf32, #tpu.memory_space<vmem>>) attributes {dimension_semantics = [#tpu.dimension_semantics<parallel>, #tpu.dimension_semantics<parallel>, #tpu.dimension_semantics<arbitrary>], iteration_bounds = array<i64: 2, 1, 1>, scalar_prefetch = 0 : i64, scratch_operands = 4 : i64, tpu.core_type = #tpu.core_type<tc>, window_params = [{transform_indices = @transform_0, window_bounds = array<i64: 1, 4, 8, 8>}, {transform_indices = @transform_1, window_bounds = array<i64: 1, 4, 8, 8>}, {transform_indices = @transform_2, window_bounds = array<i64: 1, 4, 8, 8>}, {transform_indices = @transform_3, window_bounds = array<i64: 1, 8, 32>}]} {
    %c0_i32 = arith.constant 0 : i32
    %0 = arith.cmpi eq, %arg2, %c0_i32 : i32
    %1 = arith.extui %0 : i1 to i32
    %c0_i32_0 = arith.constant 0 : i32
    %2 = arith.cmpi ne, %1, %c0_i32_0 : i32
    scf.if %2 {
      %c0_130 = arith.constant 0 : index
      %c0_131 = arith.constant 0 : index
      %c0_132 = arith.constant 0 : index
      %c0_133 = arith.constant 0 : index
      %158 = vector.load %arg3[%c0_130, %c0_131, %c0_132, %c0_133] : memref<1x4x8x8xf32, #tpu.memory_space<vmem>>, vector<1x4x8x8xf32>
      %159 = vector.shape_cast %158 : vector<1x4x8x8xf32> to vector<4x8x8xf32>
      %cst_134 = arith.constant 0.353553385 : f32
      %160 = vector.broadcast %cst_134 : f32 to vector<4x8x8xf32>
      %161 = arith.mulf %159, %160 : vector<4x8x8xf32>
      %c0_135 = arith.constant 0 : index
      %c0_136 = arith.constant 0 : index
      %c0_137 = arith.constant 0 : index
      %162 = vector.load %arg7[%c0_135, %c0_136, %c0_137] : memref<4x8x8xf32, #tpu.memory_space<vmem>>, vector<4x8x8xf32>
      tpu.vector_store %arg7[%c0_135, %c0_136, %c0_137], %161 {strides = array<i32>} : memref<4x8x8xf32, #tpu.memory_space<vmem>>, vector<4x8x8xf32>,
      %cst_138 = arith.constant 0xFF800000 : f32
      %163 = vector.broadcast %cst_138 : f32 to vector<4x8x1xf32>
      %c0_139 = arith.constant 0 : index
      %c0_140 = arith.constant 0 : index
      %c0_141 = arith.constant 0 : index
      %164 = vector.load %arg8[%c0_139, %c0_140, %c0_141] : memref<4x8x1xf32, #tpu.memory_space<vmem>>, vector<4x8x1xf32>
      tpu.vector_store %arg8[%c0_139, %c0_140, %c0_141], %163 {strides = array<i32>} : memref<4x8x1xf32, #tpu.memory_space<vmem>>, vector<4x8x1xf32>,
      %cst_142 = arith.constant 0.000000e+00 : f32
      %165 = vector.broadcast %cst_142 : f32 to vector<4x8x1xf32>
      %c0_143 = arith.constant 0 : index
      %c0_144 = arith.constant 0 : index
      %c0_145 = arith.constant 0 : index
      %166 = vector.load %arg9[%c0_143, %c0_144, %c0_145] : memref<4x8x1xf32, #tpu.memory_space<vmem>>, vector<4x8x1xf32>
      tpu.vector_store %arg9[%c0_143, %c0_144, %c0_145], %165 {strides = array<i32>} : memref<4x8x1xf32, #tpu.memory_space<vmem>>, vector<4x8x1xf32>,
      %cst_146 = arith.constant 0.000000e+00 : f32
      %167 = vector.broadcast %cst_146 : f32 to vector<4x8x8xf32>
      %c0_147 = arith.constant 0 : index
      %c0_148 = arith.constant 0 : index
      %c0_149 = arith.constant 0 : index
      %168 = vector.load %arg10[%c0_147, %c0_148, %c0_149] : memref<4x8x8xf32, #tpu.memory_space<vmem>>, vector<4x8x8xf32>
      tpu.vector_store %arg10[%c0_147, %c0_148, %c0_149], %167 {strides = array<i32>} : memref<4x8x8xf32, #tpu.memory_space<vmem>>, vector<4x8x8xf32>,
    } else {
    }
    %c0 = arith.constant 0 : index
    %c0_1 = arith.constant 0 : index
    %c0_2 = arith.constant 0 : index
    %3 = vector.load %arg7[%c0, %c0_1, %c0_2] : memref<4x8x8xf32, #tpu.memory_space<vmem>>, vector<1x8x8xf32>
    %4 = vector.shape_cast %3 : vector<1x8x8xf32> to vector<8x8xf32>
    %c0_3 = arith.constant 0 : index
    %c0_4 = arith.constant 0 : index
    %c0_5 = arith.constant 0 : index
    %c0_6 = arith.constant 0 : index
    %5 = vector.load %arg4[%c0_3, %c0_4, %c0_5, %c0_6] : memref<1x4x8x8xf32, #tpu.memory_space<vmem>>, vector<1x1x8x8xf32>
    %6 = vector.shape_cast %5 : vector<1x1x8x8xf32> to vector<8x8xf32>
    %cst = arith.constant dense<0.000000e+00> : vector<8x8xf32>
    %7 = tpu.matmul %4, %6, %cst {dimension_numbers = #tpu.dot_dimension_numbers<[1], [1], [0], [0], [0, 0, 1, 0], [], []>} : vector<8x8xf32>, vector<8x8xf32>, vector<8x8xf32> -> vector<8x8xf32>
    %c0_7 = arith.constant 0 : index
    %c0_8 = arith.constant 0 : index
    %c0_9 = arith.constant 0 : index
    %8 = vector.load %arg8[%c0_7, %c0_8, %c0_9] : memref<4x8x1xf32, #tpu.memory_space<vmem>>, vector<1x8x1xf32>
    %9 = vector.shape_cast %8 : vector<1x8x1xf32> to vector<8x1xf32>
    %cst_10 = arith.constant dense<0xFF800000> : vector<8xf32>
    %10 = vector.multi_reduction <maximumf>, %7, %cst_10 [1] : vector<8x8xf32> to vector<8xf32>
    %11 = vector.shape_cast %10 : vector<8xf32> to vector<8x1xf32>
    %12 = arith.maximumf %9, %11 : vector<8x1xf32>
    %13 = arith.subf %9, %12 : vector<8x1xf32>
    %14 = math.exp %13 : vector<8x1xf32>
    %15 = vector.broadcast %12 : vector<8x1xf32> to vector<8x8xf32>
    %16 = arith.subf %7, %15 : vector<8x8xf32>
    %17 = math.exp %16 : vector<8x8xf32>
    %c0_11 = arith.constant 0 : index
    %c0_12 = arith.constant 0 : index
    %c0_13 = arith.constant 0 : index
    %18 = vector.load %arg9[%c0_11, %c0_12, %c0_13] : memref<4x8x1xf32, #tpu.memory_space<vmem>>, vector<1x8x1xf32>
    %19 = vector.shape_cast %18 : vector<1x8x1xf32> to vector<8x1xf32>
    %20 = arith.mulf %14, %19 : vector<8x1xf32>
    %cst_14 = arith.constant dense<0.000000e+00> : vector<8xf32>
    %21 = vector.multi_reduction <add>, %17, %cst_14 [1] : vector<8x8xf32> to vector<8xf32>
    %22 = vector.shape_cast %21 : vector<8xf32> to vector<8x1xf32>
    %23 = arith.addf %20, %22 : vector<8x1xf32>
    %c0_15 = arith.constant 0 : index
    %c0_16 = arith.constant 0 : index
    %c0_17 = arith.constant 0 : index
    %24 = vector.load %arg9[%c0_15, %c0_16, %c0_17] : memref<4x8x1xf32, #tpu.memory_space<vmem>>, vector<1x8x1xf32>
    %25 = vector.shape_cast %24 : vector<1x8x1xf32> to vector<8x1xf32>
    %26 = vector.shape_cast %23 : vector<8x1xf32> to vector<1x8x1xf32>
    tpu.vector_store %arg9[%c0_15, %c0_16, %c0_17], %26 {strides = array<i32>} : memref<4x8x1xf32, #tpu.memory_space<vmem>>, vector<1x8x1xf32>,
    %c0_18 = arith.constant 0 : index
    %c0_19 = arith.constant 0 : index
    %c0_20 = arith.constant 0 : index
    %27 = vector.load %arg10[%c0_18, %c0_19, %c0_20] : memref<4x8x8xf32, #tpu.memory_space<vmem>>, vector<1x8x8xf32>
    %28 = vector.shape_cast %27 : vector<1x8x8xf32> to vector<8x8xf32>
    %29 = vector.broadcast %14 : vector<8x1xf32> to vector<8x8xf32>
    %30 = arith.mulf %29, %28 : vector<8x8xf32>
    %c0_21 = arith.constant 0 : index
    %c0_22 = arith.constant 0 : index
    %c0_23 = arith.constant 0 : index
    %c0_24 = arith.constant 0 : index
    %31 = vector.load %arg5[%c0_21, %c0_22, %c0_23, %c0_24] : memref<1x4x8x8xf32, #tpu.memory_space<vmem>>, vector<1x1x8x8xf32>
    %32 = vector.shape_cast %31 : vector<1x1x8x8xf32> to vector<8x8xf32>
    %cst_25 = arith.constant dense<0.000000e+00> : vector<8x8xf32>
    %33 = tpu.matmul %17, %32, %cst_25 {dimension_numbers = #tpu.dot_dimension_numbers<[1], [0], [0], [1], [0, 0, 1, 1], [], []>} : vector<8x8xf32>, vector<8x8xf32>, vector<8x8xf32> -> vector<8x8xf32>
    %34 = arith.addf %30, %33 : vector<8x8xf32>
    %c0_26 = arith.constant 0 : index
    %c0_27 = arith.constant 0 : index
    %c0_28 = arith.constant 0 : index
    %35 = vector.load %arg10[%c0_26, %c0_27, %c0_28] : memref<4x8x8xf32, #tpu.memory_space<vmem>>, vector<1x8x8xf32>
    %36 = vector.shape_cast %35 : vector<1x8x8xf32> to vector<8x8xf32>
    %37 = vector.shape_cast %34 : vector<8x8xf32> to vector<1x8x8xf32>
    tpu.vector_store %arg10[%c0_26, %c0_27, %c0_28], %37 {strides = array<i32>} : memref<4x8x8xf32, #tpu.memory_space<vmem>>, vector<1x8x8xf32>,
    %c0_29 = arith.constant 0 : index
    %c0_30 = arith.constant 0 : index
    %c0_31 = arith.constant 0 : index
    %38 = vector.load %arg8[%c0_29, %c0_30, %c0_31] : memref<4x8x1xf32, #tpu.memory_space<vmem>>, vector<1x8x1xf32>
    %39 = vector.shape_cast %38 : vector<1x8x1xf32> to vector<8x1xf32>
    %40 = vector.shape_cast %12 : vector<8x1xf32> to vector<1x8x1xf32>
    tpu.vector_store %arg8[%c0_29, %c0_30, %c0_31], %40 {strides = array<i32>} : memref<4x8x1xf32, #tpu.memory_space<vmem>>, vector<1x8x1xf32>,
    %c1 = arith.constant 1 : index
    %c0_32 = arith.constant 0 : index
    %c0_33 = arith.constant 0 : index
    %41 = vector.load %arg7[%c1, %c0_32, %c0_33] : memref<4x8x8xf32, #tpu.memory_space<vmem>>, vector<1x8x8xf32>
    %42 = vector.shape_cast %41 : vector<1x8x8xf32> to vector<8x8xf32>
    %c0_34 = arith.constant 0 : index
    %c1_35 = arith.constant 1 : index
    %c0_36 = arith.constant 0 : index
    %c0_37 = arith.constant 0 : index
    %43 = vector.load %arg4[%c0_34, %c1_35, %c0_36, %c0_37] : memref<1x4x8x8xf32, #tpu.memory_space<vmem>>, vector<1x1x8x8xf32>
    %44 = vector.shape_cast %43 : vector<1x1x8x8xf32> to vector<8x8xf32>
    %cst_38 = arith.constant dense<0.000000e+00> : vector<8x8xf32>
    %45 = tpu.matmul %42, %44, %cst_38 {dimension_numbers = #tpu.dot_dimension_numbers<[1], [1], [0], [0], [0, 0, 1, 0], [], []>} : vector<8x8xf32>, vector<8x8xf32>, vector<8x8xf32> -> vector<8x8xf32>
    %c1_39 = arith.constant 1 : index
    %c0_40 = arith.constant 0 : index
    %c0_41 = arith.constant 0 : index
    %46 = vector.load %arg8[%c1_39, %c0_40, %c0_41] : memref<4x8x1xf32, #tpu.memory_space<vmem>>, vector<1x8x1xf32>
    %47 = vector.shape_cast %46 : vector<1x8x1xf32> to vector<8x1xf32>
    %cst_42 = arith.constant dense<0xFF800000> : vector<8xf32>
    %48 = vector.multi_reduction <maximumf>, %45, %cst_42 [1] : vector<8x8xf32> to vector<8xf32>
    %49 = vector.shape_cast %48 : vector<8xf32> to vector<8x1xf32>
    %50 = arith.maximumf %47, %49 : vector<8x1xf32>
    %51 = arith.subf %47, %50 : vector<8x1xf32>
    %52 = math.exp %51 : vector<8x1xf32>
    %53 = vector.broadcast %50 : vector<8x1xf32> to vector<8x8xf32>
    %54 = arith.subf %45, %53 : vector<8x8xf32>
    %55 = math.exp %54 : vector<8x8xf32>
    %c1_43 = arith.constant 1 : index
    %c0_44 = arith.constant 0 : index
    %c0_45 = arith.constant 0 : index
    %56 = vector.load %arg9[%c1_43, %c0_44, %c0_45] : memref<4x8x1xf32, #tpu.memory_space<vmem>>, vector<1x8x1xf32>
    %57 = vector.shape_cast %56 : vector<1x8x1xf32> to vector<8x1xf32>
    %58 = arith.mulf %52, %57 : vector<8x1xf32>
    %cst_46 = arith.constant dense<0.000000e+00> : vector<8xf32>
    %59 = vector.multi_reduction <add>, %55, %cst_46 [1] : vector<8x8xf32> to vector<8xf32>
    %60 = vector.shape_cast %59 : vector<8xf32> to vector<8x1xf32>
    %61 = arith.addf %58, %60 : vector<8x1xf32>
    %c1_47 = arith.constant 1 : index
    %c0_48 = arith.constant 0 : index
    %c0_49 = arith.constant 0 : index
    %62 = vector.load %arg9[%c1_47, %c0_48, %c0_49] : memref<4x8x1xf32, #tpu.memory_space<vmem>>, vector<1x8x1xf32>
    %63 = vector.shape_cast %62 : vector<1x8x1xf32> to vector<8x1xf32>
    %64 = vector.shape_cast %61 : vector<8x1xf32> to vector<1x8x1xf32>
    tpu.vector_store %arg9[%c1_47, %c0_48, %c0_49], %64 {strides = array<i32>} : memref<4x8x1xf32, #tpu.memory_space<vmem>>, vector<1x8x1xf32>,
    %c1_50 = arith.constant 1 : index
    %c0_51 = arith.constant 0 : index
    %c0_52 = arith.constant 0 : index
    %65 = vector.load %arg10[%c1_50, %c0_51, %c0_52] : memref<4x8x8xf32, #tpu.memory_space<vmem>>, vector<1x8x8xf32>
    %66 = vector.shape_cast %65 : vector<1x8x8xf32> to vector<8x8xf32>
    %67 = vector.broadcast %52 : vector<8x1xf32> to vector<8x8xf32>
    %68 = arith.mulf %67, %66 : vector<8x8xf32>
    %c0_53 = arith.constant 0 : index
    %c1_54 = arith.constant 1 : index
    %c0_55 = arith.constant 0 : index
    %c0_56 = arith.constant 0 : index
    %69 = vector.load %arg5[%c0_53, %c1_54, %c0_55, %c0_56] : memref<1x4x8x8xf32, #tpu.memory_space<vmem>>, vector<1x1x8x8xf32>
    %70 = vector.shape_cast %69 : vector<1x1x8x8xf32> to vector<8x8xf32>
    %cst_57 = arith.constant dense<0.000000e+00> : vector<8x8xf32>
    %71 = tpu.matmul %55, %70, %cst_57 {dimension_numbers = #tpu.dot_dimension_numbers<[1], [0], [0], [1], [0, 0, 1, 1], [], []>} : vector<8x8xf32>, vector<8x8xf32>, vector<8x8xf32> -> vector<8x8xf32>
    %72 = arith.addf %68, %71 : vector<8x8xf32>
    %c1_58 = arith.constant 1 : index
    %c0_59 = arith.constant 0 : index
    %c0_60 = arith.constant 0 : index
    %73 = vector.load %arg10[%c1_58, %c0_59, %c0_60] : memref<4x8x8xf32, #tpu.memory_space<vmem>>, vector<1x8x8xf32>
    %74 = vector.shape_cast %73 : vector<1x8x8xf32> to vector<8x8xf32>
    %75 = vector.shape_cast %72 : vector<8x8xf32> to vector<1x8x8xf32>
    tpu.vector_store %arg10[%c1_58, %c0_59, %c0_60], %75 {strides = array<i32>} : memref<4x8x8xf32, #tpu.memory_space<vmem>>, vector<1x8x8xf32>,
    %c1_61 = arith.constant 1 : index
    %c0_62 = arith.constant 0 : index
    %c0_63 = arith.constant 0 : index
    %76 = vector.load %arg8[%c1_61, %c0_62, %c0_63] : memref<4x8x1xf32, #tpu.memory_space<vmem>>, vector<1x8x1xf32>
    %77 = vector.shape_cast %76 : vector<1x8x1xf32> to vector<8x1xf32>
    %78 = vector.shape_cast %50 : vector<8x1xf32> to vector<1x8x1xf32>
    tpu.vector_store %arg8[%c1_61, %c0_62, %c0_63], %78 {strides = array<i32>} : memref<4x8x1xf32, #tpu.memory_space<vmem>>, vector<1x8x1xf32>,
    %c2 = arith.constant 2 : index
    %c0_64 = arith.constant 0 : index
    %c0_65 = arith.constant 0 : index
    %79 = vector.load %arg7[%c2, %c0_64, %c0_65] : memref<4x8x8xf32, #tpu.memory_space<vmem>>, vector<1x8x8xf32>
    %80 = vector.shape_cast %79 : vector<1x8x8xf32> to vector<8x8xf32>
    %c0_66 = arith.constant 0 : index
    %c2_67 = arith.constant 2 : index
    %c0_68 = arith.constant 0 : index
    %c0_69 = arith.constant 0 : index
    %81 = vector.load %arg4[%c0_66, %c2_67, %c0_68, %c0_69] : memref<1x4x8x8xf32, #tpu.memory_space<vmem>>, vector<1x1x8x8xf32>
    %82 = vector.shape_cast %81 : vector<1x1x8x8xf32> to vector<8x8xf32>
    %cst_70 = arith.constant dense<0.000000e+00> : vector<8x8xf32>
    %83 = tpu.matmul %80, %82, %cst_70 {dimension_numbers = #tpu.dot_dimension_numbers<[1], [1], [0], [0], [0, 0, 1, 0], [], []>} : vector<8x8xf32>, vector<8x8xf32>, vector<8x8xf32> -> vector<8x8xf32>
    %c2_71 = arith.constant 2 : index
    %c0_72 = arith.constant 0 : index
    %c0_73 = arith.constant 0 : index
    %84 = vector.load %arg8[%c2_71, %c0_72, %c0_73] : memref<4x8x1xf32, #tpu.memory_space<vmem>>, vector<1x8x1xf32>
    %85 = vector.shape_cast %84 : vector<1x8x1xf32> to vector<8x1xf32>
    %cst_74 = arith.constant dense<0xFF800000> : vector<8xf32>
    %86 = vector.multi_reduction <maximumf>, %83, %cst_74 [1] : vector<8x8xf32> to vector<8xf32>
    %87 = vector.shape_cast %86 : vector<8xf32> to vector<8x1xf32>
    %88 = arith.maximumf %85, %87 : vector<8x1xf32>
    %89 = arith.subf %85, %88 : vector<8x1xf32>
    %90 = math.exp %89 : vector<8x1xf32>
    %91 = vector.broadcast %88 : vector<8x1xf32> to vector<8x8xf32>
    %92 = arith.subf %83, %91 : vector<8x8xf32>
    %93 = math.exp %92 : vector<8x8xf32>
    %c2_75 = arith.constant 2 : index
    %c0_76 = arith.constant 0 : index
    %c0_77 = arith.constant 0 : index
    %94 = vector.load %arg9[%c2_75, %c0_76, %c0_77] : memref<4x8x1xf32, #tpu.memory_space<vmem>>, vector<1x8x1xf32>
    %95 = vector.shape_cast %94 : vector<1x8x1xf32> to vector<8x1xf32>
    %96 = arith.mulf %90, %95 : vector<8x1xf32>
    %cst_78 = arith.constant dense<0.000000e+00> : vector<8xf32>
    %97 = vector.multi_reduction <add>, %93, %cst_78 [1] : vector<8x8xf32> to vector<8xf32>
    %98 = vector.shape_cast %97 : vector<8xf32> to vector<8x1xf32>
    %99 = arith.addf %96, %98 : vector<8x1xf32>
    %c2_79 = arith.constant 2 : index
    %c0_80 = arith.constant 0 : index
    %c0_81 = arith.constant 0 : index
    %100 = vector.load %arg9[%c2_79, %c0_80, %c0_81] : memref<4x8x1xf32, #tpu.memory_space<vmem>>, vector<1x8x1xf32>
    %101 = vector.shape_cast %100 : vector<1x8x1xf32> to vector<8x1xf32>
    %102 = vector.shape_cast %99 : vector<8x1xf32> to vector<1x8x1xf32>
    tpu.vector_store %arg9[%c2_79, %c0_80, %c0_81], %102 {strides = array<i32>} : memref<4x8x1xf32, #tpu.memory_space<vmem>>, vector<1x8x1xf32>,
    %c2_82 = arith.constant 2 : index
    %c0_83 = arith.constant 0 : index
    %c0_84 = arith.constant 0 : index
    %103 = vector.load %arg10[%c2_82, %c0_83, %c0_84] : memref<4x8x8xf32, #tpu.memory_space<vmem>>, vector<1x8x8xf32>
    %104 = vector.shape_cast %103 : vector<1x8x8xf32> to vector<8x8xf32>
    %105 = vector.broadcast %90 : vector<8x1xf32> to vector<8x8xf32>
    %106 = arith.mulf %105, %104 : vector<8x8xf32>
    %c0_85 = arith.constant 0 : index
    %c2_86 = arith.constant 2 : index
    %c0_87 = arith.constant 0 : index
    %c0_88 = arith.constant 0 : index
    %107 = vector.load %arg5[%c0_85, %c2_86, %c0_87, %c0_88] : memref<1x4x8x8xf32, #tpu.memory_space<vmem>>, vector<1x1x8x8xf32>
    %108 = vector.shape_cast %107 : vector<1x1x8x8xf32> to vector<8x8xf32>
    %cst_89 = arith.constant dense<0.000000e+00> : vector<8x8xf32>
    %109 = tpu.matmul %93, %108, %cst_89 {dimension_numbers = #tpu.dot_dimension_numbers<[1], [0], [0], [1], [0, 0, 1, 1], [], []>} : vector<8x8xf32>, vector<8x8xf32>, vector<8x8xf32> -> vector<8x8xf32>
    %110 = arith.addf %106, %109 : vector<8x8xf32>
    %c2_90 = arith.constant 2 : index
    %c0_91 = arith.constant 0 : index
    %c0_92 = arith.constant 0 : index
    %111 = vector.load %arg10[%c2_90, %c0_91, %c0_92] : memref<4x8x8xf32, #tpu.memory_space<vmem>>, vector<1x8x8xf32>
    %112 = vector.shape_cast %111 : vector<1x8x8xf32> to vector<8x8xf32>
    %113 = vector.shape_cast %110 : vector<8x8xf32> to vector<1x8x8xf32>
    tpu.vector_store %arg10[%c2_90, %c0_91, %c0_92], %113 {strides = array<i32>} : memref<4x8x8xf32, #tpu.memory_space<vmem>>, vector<1x8x8xf32>,
    %c2_93 = arith.constant 2 : index
    %c0_94 = arith.constant 0 : index
    %c0_95 = arith.constant 0 : index
    %114 = vector.load %arg8[%c2_93, %c0_94, %c0_95] : memref<4x8x1xf32, #tpu.memory_space<vmem>>, vector<1x8x1xf32>
    %115 = vector.shape_cast %114 : vector<1x8x1xf32> to vector<8x1xf32>
    %116 = vector.shape_cast %88 : vector<8x1xf32> to vector<1x8x1xf32>
    tpu.vector_store %arg8[%c2_93, %c0_94, %c0_95], %116 {strides = array<i32>} : memref<4x8x1xf32, #tpu.memory_space<vmem>>, vector<1x8x1xf32>,
    %c3 = arith.constant 3 : index
    %c0_96 = arith.constant 0 : index
    %c0_97 = arith.constant 0 : index
    %117 = vector.load %arg7[%c3, %c0_96, %c0_97] : memref<4x8x8xf32, #tpu.memory_space<vmem>>, vector<1x8x8xf32>
    %118 = vector.shape_cast %117 : vector<1x8x8xf32> to vector<8x8xf32>
    %c0_98 = arith.constant 0 : index
    %c3_99 = arith.constant 3 : index
    %c0_100 = arith.constant 0 : index
    %c0_101 = arith.constant 0 : index
    %119 = vector.load %arg4[%c0_98, %c3_99, %c0_100, %c0_101] : memref<1x4x8x8xf32, #tpu.memory_space<vmem>>, vector<1x1x8x8xf32>
    %120 = vector.shape_cast %119 : vector<1x1x8x8xf32> to vector<8x8xf32>
    %cst_102 = arith.constant dense<0.000000e+00> : vector<8x8xf32>
    %121 = tpu.matmul %118, %120, %cst_102 {dimension_numbers = #tpu.dot_dimension_numbers<[1], [1], [0], [0], [0, 0, 1, 0], [], []>} : vector<8x8xf32>, vector<8x8xf32>, vector<8x8xf32> -> vector<8x8xf32>
    %c3_103 = arith.constant 3 : index
    %c0_104 = arith.constant 0 : index
    %c0_105 = arith.constant 0 : index
    %122 = vector.load %arg8[%c3_103, %c0_104, %c0_105] : memref<4x8x1xf32, #tpu.memory_space<vmem>>, vector<1x8x1xf32>
    %123 = vector.shape_cast %122 : vector<1x8x1xf32> to vector<8x1xf32>
    %cst_106 = arith.constant dense<0xFF800000> : vector<8xf32>
    %124 = vector.multi_reduction <maximumf>, %121, %cst_106 [1] : vector<8x8xf32> to vector<8xf32>
    %125 = vector.shape_cast %124 : vector<8xf32> to vector<8x1xf32>
    %126 = arith.maximumf %123, %125 : vector<8x1xf32>
    %127 = arith.subf %123, %126 : vector<8x1xf32>
    %128 = math.exp %127 : vector<8x1xf32>
    %129 = vector.broadcast %126 : vector<8x1xf32> to vector<8x8xf32>
    %130 = arith.subf %121, %129 : vector<8x8xf32>
    %131 = math.exp %130 : vector<8x8xf32>
    %c3_107 = arith.constant 3 : index
    %c0_108 = arith.constant 0 : index
    %c0_109 = arith.constant 0 : index
    %132 = vector.load %arg9[%c3_107, %c0_108, %c0_109] : memref<4x8x1xf32, #tpu.memory_space<vmem>>, vector<1x8x1xf32>
    %133 = vector.shape_cast %132 : vector<1x8x1xf32> to vector<8x1xf32>
    %134 = arith.mulf %128, %133 : vector<8x1xf32>
    %cst_110 = arith.constant dense<0.000000e+00> : vector<8xf32>
    %135 = vector.multi_reduction <add>, %131, %cst_110 [1] : vector<8x8xf32> to vector<8xf32>
    %136 = vector.shape_cast %135 : vector<8xf32> to vector<8x1xf32>
    %137 = arith.addf %134, %136 : vector<8x1xf32>
    %c3_111 = arith.constant 3 : index
    %c0_112 = arith.constant 0 : index
    %c0_113 = arith.constant 0 : index
    %138 = vector.load %arg9[%c3_111, %c0_112, %c0_113] : memref<4x8x1xf32, #tpu.memory_space<vmem>>, vector<1x8x1xf32>
    %139 = vector.shape_cast %138 : vector<1x8x1xf32> to vector<8x1xf32>
    %140 = vector.shape_cast %137 : vector<8x1xf32> to vector<1x8x1xf32>
    tpu.vector_store %arg9[%c3_111, %c0_112, %c0_113], %140 {strides = array<i32>} : memref<4x8x1xf32, #tpu.memory_space<vmem>>, vector<1x8x1xf32>,
    %c3_114 = arith.constant 3 : index
    %c0_115 = arith.constant 0 : index
    %c0_116 = arith.constant 0 : index
    %141 = vector.load %arg10[%c3_114, %c0_115, %c0_116] : memref<4x8x8xf32, #tpu.memory_space<vmem>>, vector<1x8x8xf32>
    %142 = vector.shape_cast %141 : vector<1x8x8xf32> to vector<8x8xf32>
    %143 = vector.broadcast %128 : vector<8x1xf32> to vector<8x8xf32>
    %144 = arith.mulf %143, %142 : vector<8x8xf32>
    %c0_117 = arith.constant 0 : index
    %c3_118 = arith.constant 3 : index
    %c0_119 = arith.constant 0 : index
    %c0_120 = arith.constant 0 : index
    %145 = vector.load %arg5[%c0_117, %c3_118, %c0_119, %c0_120] : memref<1x4x8x8xf32, #tpu.memory_space<vmem>>, vector<1x1x8x8xf32>
    %146 = vector.shape_cast %145 : vector<1x1x8x8xf32> to vector<8x8xf32>
    %cst_121 = arith.constant dense<0.000000e+00> : vector<8x8xf32>
    %147 = tpu.matmul %131, %146, %cst_121 {dimension_numbers = #tpu.dot_dimension_numbers<[1], [0], [0], [1], [0, 0, 1, 1], [], []>} : vector<8x8xf32>, vector<8x8xf32>, vector<8x8xf32> -> vector<8x8xf32>
    %148 = arith.addf %144, %147 : vector<8x8xf32>
    %c3_122 = arith.constant 3 : index
    %c0_123 = arith.constant 0 : index
    %c0_124 = arith.constant 0 : index
    %149 = vector.load %arg10[%c3_122, %c0_123, %c0_124] : memref<4x8x8xf32, #tpu.memory_space<vmem>>, vector<1x8x8xf32>
    %150 = vector.shape_cast %149 : vector<1x8x8xf32> to vector<8x8xf32>
    %151 = vector.shape_cast %148 : vector<8x8xf32> to vector<1x8x8xf32>
    tpu.vector_store %arg10[%c3_122, %c0_123, %c0_124], %151 {strides = array<i32>} : memref<4x8x8xf32, #tpu.memory_space<vmem>>, vector<1x8x8xf32>,
    %c3_125 = arith.constant 3 : index
    %c0_126 = arith.constant 0 : index
    %c0_127 = arith.constant 0 : index
    %152 = vector.load %arg8[%c3_125, %c0_126, %c0_127] : memref<4x8x1xf32, #tpu.memory_space<vmem>>, vector<1x8x1xf32>
    %153 = vector.shape_cast %152 : vector<1x8x1xf32> to vector<8x1xf32>
    %154 = vector.shape_cast %126 : vector<8x1xf32> to vector<1x8x1xf32>
    tpu.vector_store %arg8[%c3_125, %c0_126, %c0_127], %154 {strides = array<i32>} : memref<4x8x1xf32, #tpu.memory_space<vmem>>, vector<1x8x1xf32>,
    %c0_i32_128 = arith.constant 0 : i32
    %155 = arith.cmpi eq, %arg2, %c0_i32_128 : i32
    %156 = arith.extui %155 : i1 to i32
    %c0_i32_129 = arith.constant 0 : i32
    %157 = arith.cmpi ne, %156, %c0_i32_129 : i32
    scf.if %157 {
      %c0_130 = arith.constant 0 : index
      %c0_131 = arith.constant 0 : index
      %c0_132 = arith.constant 0 : index
      %158 = vector.load %arg10[%c0_130, %c0_131, %c0_132] : memref<4x8x8xf32, #tpu.memory_space<vmem>>, vector<1x8x8xf32>
      %159 = vector.shape_cast %158 : vector<1x8x8xf32> to vector<8x8xf32>
      %c0_133 = arith.constant 0 : index
      %c0_134 = arith.constant 0 : index
      %c0_135 = arith.constant 0 : index
      %160 = vector.load %arg9[%c0_133, %c0_134, %c0_135] : memref<4x8x1xf32, #tpu.memory_space<vmem>>, vector<1x8x1xf32>
      %161 = vector.shape_cast %160 : vector<1x8x1xf32> to vector<8x1xf32>
      %162 = vector.broadcast %161 : vector<8x1xf32> to vector<8x8xf32>
      %163 = arith.divf %159, %162 : vector<8x8xf32>
      %c1_136 = arith.constant 1 : index
      %c0_137 = arith.constant 0 : index
      %c0_138 = arith.constant 0 : index
      %164 = vector.load %arg10[%c1_136, %c0_137, %c0_138] : memref<4x8x8xf32, #tpu.memory_space<vmem>>, vector<1x8x8xf32>
      %165 = vector.shape_cast %164 : vector<1x8x8xf32> to vector<8x8xf32>
      %c1_139 = arith.constant 1 : index
      %c0_140 = arith.constant 0 : index
      %c0_141 = arith.constant 0 : index
      %166 = vector.load %arg9[%c1_139, %c0_140, %c0_141] : memref<4x8x1xf32, #tpu.memory_space<vmem>>, vector<1x8x1xf32>
      %167 = vector.shape_cast %166 : vector<1x8x1xf32> to vector<8x1xf32>
      %168 = vector.broadcast %167 : vector<8x1xf32> to vector<8x8xf32>
      %169 = arith.divf %165, %168 : vector<8x8xf32>
      %c2_142 = arith.constant 2 : index
      %c0_143 = arith.constant 0 : index
      %c0_144 = arith.constant 0 : index
      %170 = vector.load %arg10[%c2_142, %c0_143, %c0_144] : memref<4x8x8xf32, #tpu.memory_space<vmem>>, vector<1x8x8xf32>
      %171 = vector.shape_cast %170 : vector<1x8x8xf32> to vector<8x8xf32>
      %c2_145 = arith.constant 2 : index
      %c0_146 = arith.constant 0 : index
      %c0_147 = arith.constant 0 : index
      %172 = vector.load %arg9[%c2_145, %c0_146, %c0_147] : memref<4x8x1xf32, #tpu.memory_space<vmem>>, vector<1x8x1xf32>
      %173 = vector.shape_cast %172 : vector<1x8x1xf32> to vector<8x1xf32>
      %174 = vector.broadcast %173 : vector<8x1xf32> to vector<8x8xf32>
      %175 = arith.divf %171, %174 : vector<8x8xf32>
      %c3_148 = arith.constant 3 : index
      %c0_149 = arith.constant 0 : index
      %c0_150 = arith.constant 0 : index
      %176 = vector.load %arg10[%c3_148, %c0_149, %c0_150] : memref<4x8x8xf32, #tpu.memory_space<vmem>>, vector<1x8x8xf32>
      %177 = vector.shape_cast %176 : vector<1x8x8xf32> to vector<8x8xf32>
      %c3_151 = arith.constant 3 : index
      %c0_152 = arith.constant 0 : index
      %c0_153 = arith.constant 0 : index
      %178 = vector.load %arg9[%c3_151, %c0_152, %c0_153] : memref<4x8x1xf32, #tpu.memory_space<vmem>>, vector<1x8x1xf32>
      %179 = vector.shape_cast %178 : vector<1x8x1xf32> to vector<8x1xf32>
      %180 = vector.broadcast %179 : vector<8x1xf32> to vector<8x8xf32>
      %181 = arith.divf %177, %180 : vector<8x8xf32>
      %182 = tpu.concatenate %163, %169, %175, %181 in 1 : vector<8x8xf32>, vector<8x8xf32>, vector<8x8xf32>, vector<8x8xf32> -> vector<8x32xf32>
      %c0_154 = arith.constant 0 : index
      %c0_155 = arith.constant 0 : index
      %c0_156 = arith.constant 0 : index
      %183 = vector.load %arg6[%c0_154, %c0_155, %c0_156] : memref<1x8x32xf32, #tpu.memory_space<vmem>>, vector<1x8x32xf32>
      %184 = vector.shape_cast %183 : vector<1x8x32xf32> to vector<8x32xf32>
      %185 = vector.shape_cast %182 : vector<8x32xf32> to vector<1x8x32xf32>
      tpu.vector_store %arg6[%c0_154, %c0_155, %c0_156], %185 {strides = array<i32>} : memref<1x8x32xf32, #tpu.memory_space<vmem>>, vector<1x8x32xf32>,
    } else {
    }
    return
  }
  func.func @transform_0(%arg0: i32, %arg1: i32, %arg2: i32) -> (i32, i32, i32, i32) {
    %c0_i32 = arith.constant 0 : i32
    %c0_i32_0 = arith.constant 0 : i32
    %c0_i32_1 = arith.constant 0 : i32
    return %arg0, %c0_i32, %arg1, %c0_i32_0 : i32, i32, i32, i32
  }
  func.func @transform_1(%arg0: i32, %arg1: i32, %arg2: i32) -> (i32, i32, i32, i32) {
    %c0_i32 = arith.constant 0 : i32
    %c0_i32_0 = arith.constant 0 : i32
    %c0_i32_1 = arith.constant 0 : i32
    return %arg0, %c0_i32, %arg2, %c0_i32_0 : i32, i32, i32, i32
  }
  func.func @transform_2(%arg0: i32, %arg1: i32, %arg2: i32) -> (i32, i32, i32, i32) {
    %c0_i32 = arith.constant 0 : i32
    %c0_i32_0 = arith.constant 0 : i32
    %c0_i32_1 = arith.constant 0 : i32
    return %arg0, %c0_i32, %arg2, %c0_i32_0 : i32, i32, i32, i32
  }
  func.func @transform_3(%arg0: i32, %arg1: i32, %arg2: i32) -> (i32, i32, i32) {
    %c0_i32 = arith.constant 0 : i32
    %c0_i32_0 = arith.constant 0 : i32
    return %arg0, %arg1, %c0_i32 : i32, i32, i32
  }
}

</mosaic_0001>

<bundles_post_ra>
// kernel: mha_forward.3
= control target key start
LH: loop header
LB: loop body
LE: loop exit
PB: predicated region body
PF: predicated region fallthrough
CT: control target
= control target key end

     0   :  { %8 = vsyncpa [#allocation4], 0  ;;  %s283_s0 = inlined_call_operand.hbm [shape: f32[16,32], index: 0, kind: input, shape index: {}]   ;;  %s284_s1 = inlined_call_operand.hbm [shape: f32[32,96], index: 1, kind: input, shape index: {}]   ;;  %s285_s2 = inlined_call_operand.vmem [shape: f32[1,96], index: 2, kind: input, shape index: {}]   ;;  %s286_s3 = inlined_call_operand.vmem [shape: f32[16,96], index: 3, kind: output, shape index: {}]  }
   0x1   :  { %9 = vsyncpa [#allocation6], 0  ;;  %s235_s12 = smov [#allocation3]  }
   0x2   :  { %s15_s13 = sshll.u32 %s235_s12, 4  ;;  %s16_s13 = int_to_ptr.vmem [resolvable:$true] %s15_s13 }
   0x3   :  { %s199_s14 = scalar_lea.vmem %s16_s13, 256  ;;  %p204_p1 = scmp.lt.s32.totalorder %s16_s13, %s16_s13 }
   0x4   :  { %p200_p0 = scmp.ne.s32.totalorder %s16_s13, %s199_s14  ;;  %p205_p2 = scmp.lt.s32.totalorder %s199_s14, %s199_s14 }
   0x6   :  { %p206_p3 = por %p205_p2, %p204_p1 }
   0x8   :  { %p207_p4 = pnand %p206_p3, %p200_p0 }
   0xa   :  { %210 = shalt.err (!%p207_p4)
}
   0xb   :  { %s236_s15 = smov 128   ;;  %s237_s16 = smov 8  }
   0xc   :  { %21 = dma.hbm_to_vmem [thread:$0]  %s283_s0, 256, %s16_s13, [#allocation4], %s236_s15, %s236_s15, %s237_s16  }
   0xd   :  { %s238_s19 = smov [#allocation5]  }
   0xe   :  { %s27_s20 = sshll.u32 %s238_s19, 4  ;;  %s28_s20 = int_to_ptr.vmem [resolvable:$true] %s27_s20 }
   0xf   :  { %s219_s21 = scalar_lea.vmem %s28_s20, 512  ;;  %p224_p6 = scmp.lt.s32.totalorder %s28_s20, %s28_s20 }
  0x10   :  { %p220_p5 = scmp.ne.s32.totalorder %s28_s20, %s219_s21  ;;  %p225_p7 = scmp.lt.s32.totalorder %s219_s21, %s219_s21 }
  0x12   :  { %p226_p8 = por %p225_p7, %p224_p6 }
  0x14   :  { %p227_p9 = pnand %p226_p8, %p220_p5 }
  0x16   :  { %230 = shalt.err (!%p227_p9)
}
  0x17   :  { %33 = dma.hbm_to_vmem [thread:$0]  %s284_s1, 512, %s28_s20, [#allocation6], %s236_s15, %s236_s15, %s237_s16  }
  0x18   :  { %231 = dma.done.wait [#allocation4], 256  }
  0x19   :  { %232 = vsyncadd [#allocation4], 4294967040 }
  0x1a   :  { %233 = dma.done.wait [#allocation6], 512  }
  0x1b   :  { %234 = vsyncadd [#allocation6], 4294966784  ;;  %vm46_vm0 = vcmask 785408   ;;  %v239_v0 = vmov 0.0   ;;  %vm57_vm1 = vcmask 261120   ;;  %v56_v1 = vld [vmem:[#allocation5 + $0x18] sm:$0xff] }
  0x1c   :  { %48 = vst.msk [vmem:[#allocation2 + $0x8] sm:$0xff] %vm46_vm0, %v239_v0  ;;  %47 = vst.msk [vmem:[#allocation2] sm:$0xff] %vm46_vm0, %v239_v0  ;;  %v55_v2 = vld [vmem:[#allocation5 + $0x10] sm:$0xff]  ;;  %175 = vmatprep.subr.mxu0 %v56_v1  ;;  %v54_v4 = vld [vmem:[#allocation5 + $0x8] sm:$0xff] }
  0x1d   :  { %v51_v3 = vld [vmem:[#allocation3] sm:$0xff]  ;;  %176 = vmatpush3.msra.mxu0 %v56_v1  ;;  %v53_v5 = vld [vmem:[#allocation5] sm:$0xff]  ;;  %v52_v6 = vld [vmem:[#allocation3 + $0x8] sm:$0xff] }
  0x1e   :  { %183 = vmatprep.mubr.msk.f32.mxu0 %vm57_vm1, %v51_v3  ;;  %177 = vmatprep.subr.mxu0 %v55_v2  ;;  %v168_v13 = vld [vmem:[%s285_s2] ss:$0 sm:$0xff] }
  0x1f   :  { %178 = vmatpush3.msra.mxu0 %v55_v2 }
  0x20   :  { %179 = vmatprep.subr.mxu0 %v54_v4 }
  0x21   :  { %180 = vmatpush3.msra.mxu0 %v54_v4 }
  0x22   :  { %181 = vmatprep.subr.mxu0 %v53_v5 }
  0x23   :  { %182 = vmatpush3.msra.mxu0 %v53_v5  ;;  %v50_v7 = vld [vmem:[#allocation2 + $0x8] sm:$0xff]  ;;  %v49_v9 = vld [vmem:[#allocation2] sm:$0xff] }
  0x24   :  { %184 = vmatmul.mubr.msk.f32.vlgmr.msra.gmra.mxu0 %vm57_vm1, %v52_v6 }
  0xe4   :  { %v185_v8 = vpop.f32.mrf.mxu0 }
  0xe5   :  { %v140_v10 = vadd.f32 %v185_v8, %v50_v7 }
  0xe6   :  { %v130_v11 = vpop.f32.mrf.mxu0 }
  0xe7   :  { %143 = vst.msk [vmem:[#allocation2 + $0x8] sm:$0xff] %vm46_vm0, %v140_v10  ;;  %v139_v12 = vadd.f32 %v130_v11, %v49_v9 }
  0xe9   :  { %142 = vst.msk [vmem:[#allocation2] sm:$0xff] %vm46_vm0, %v139_v12 }
  0xee   :  { %v148_v14 = vld [vmem:[#allocation2 + $0x8] sm:$0xff] }
  0xef   :  { %v157_v15 = vadd.f32 %v168_v13, %v148_v14 }
  0xf0   :  { %v147_v16 = vld [vmem:[#allocation2] sm:$0xff] }
  0xf1   :  { %159 = vst.msk [vmem:[%s286_s3 + $0x8] sm:$0xff] %vm46_vm0, %v157_v15  ;;  %v156_v17 = vadd.f32 %v168_v13, %v147_v16 }
  0xf3   :  { %158 = vst.msk [vmem:[%s286_s3] sm:$0xff] %vm46_vm0, %v156_v17 }
  0xf4   :  { %164 = vsyncpa [#allocation4], 1 }
  0xf5   :  { %165 = vsyncpa [#allocation6], 1 }

// kernel: mha_forward.5
= control target key start
LH: loop header
LB: loop body
LE: loop exit
PB: predicated region body
PF: predicated region fallthrough
CT: control target
= control target key end

     0   :  { %vm19_vm0 = vcmask 261120   ;;  %v194_v3 = vmov 0.0   ;;  %s250_s0 = inlined_call_operand.vmem [shape: f32[16,32], index: 0, kind: input, shape index: {}]   ;;  %s251_s1 = inlined_call_operand.vmem [shape: f32[32,32], index: 1, kind: input, shape index: {}]   ;;  %s252_s2 = inlined_call_operand.vmem [shape: f32[1,32], index: 2, kind: input, shape index: {}]   ;;  %s253_s3 = inlined_call_operand.hbm [shape: f32[16,32], index: 3, kind: output, shape index: {}]  }
   0x1   :  { %v29_v0 = vld [vmem:[%s251_s1 + $0x18] sm:$0xff]  ;;  %v28_v1 = vld [vmem:[%s251_s1 + $0x10] sm:$0xff]  ;;  %v24_v2 = vld [vmem:[%s250_s0] sm:$0xff]  ;;  %21 = vst.msk [vmem:[#allocation2 + $0x8] sm:$0xff] %vm19_vm0, %v194_v3 }
   0x2   :  { %157 = vmatprep.subr.mxu0 %v29_v0  ;;  %20 = vst.msk [vmem:[#allocation2] sm:$0xff] %vm19_vm0, %v194_v3  ;;  %v27_v4 = vld [vmem:[%s251_s1 + $0x8] sm:$0xff]  ;;  %165 = vmatprep.mubr.msk.f32.mxu0 %vm19_vm0, %v24_v2 }
   0x3   :  { %158 = vmatpush3.msra.mxu0 %v29_v0 }
   0x4   :  { %8 = vsyncpa [#allocation4], 0  ;;  %159 = vmatprep.subr.mxu0 %v28_v1  ;;  %v26_v5 = vld [vmem:[%s251_s1] sm:$0xff]  ;;  %v25_v6 = vld [vmem:[%s250_s0 + $0x8] sm:$0xff]  ;;  %s195_s25 = smov [#allocation3]  }
   0x5   :  { %160 = vmatpush3.msra.mxu0 %v28_v1  ;;  %v150_v13 = vld [vmem:[%s252_s2] ss:$0 sm:$0xff]  ;;  %s137_s0 = sshll.u32 %s195_s25, 4  ;;  %s138_s0 = int_to_ptr.vmem [resolvable:$true] %s137_s0 }
   0x6   :  { %161 = vmatprep.subr.mxu0 %v27_v4  ;;  %s172_s26 = scalar_lea.vmem %s138_s0, 256  ;;  %p177_p1 = scmp.lt.s32.totalorder %s138_s0, %s138_s0 }
   0x7   :  { %162 = vmatpush3.msra.mxu0 %v27_v4  ;;  %p173_p0 = scmp.ne.s32.totalorder %s138_s0, %s172_s26  ;;  %p178_p2 = scmp.lt.s32.totalorder %s172_s26, %s172_s26 }
   0x8   :  { %163 = vmatprep.subr.mxu0 %v26_v5  ;;  %v23_v7 = vld [vmem:[#allocation2 + $0x8] sm:$0xff] }
   0x9   :  { %164 = vmatpush3.msra.mxu0 %v26_v5  ;;  %v22_v9 = vld [vmem:[#allocation2] sm:$0xff]  ;;  %p179_p3 = por %p178_p2, %p177_p1 }
   0xa   :  { %166 = vmatmul.mubr.msk.f32.vlgmr.msra.gmra.mxu0 %vm19_vm0, %v25_v6 }
   0xb   :  { %p180_p4 = pnand %p179_p3, %p173_p0 }
  0xca   :  { %v167_v8 = vpop.f32.mrf.mxu0 }
  0xcb   :  { %v113_v10 = vadd.f32 %v167_v8, %v23_v7 }
  0xcc   :  { %v103_v11 = vpop.f32.mrf.mxu0 }
  0xcd   :  { %115 = vst.msk [vmem:[#allocation2 + $0x8] sm:$0xff] %vm19_vm0, %v113_v10  ;;  %v112_v12 = vadd.f32 %v103_v11, %v22_v9 }
  0xcf   :  { %114 = vst.msk [vmem:[#allocation2] sm:$0xff] %vm19_vm0, %v112_v12 }
  0xd4   :  { %v120_v14 = vld [vmem:[#allocation2 + $0x8] sm:$0xff] }
  0xd5   :  { %v129_v15 = vadd.f32 %v150_v13, %v120_v14 }
  0xd6   :  { %v119_v16 = vld [vmem:[#allocation2] sm:$0xff] }
  0xd7   :  { %v128_v17 = vadd.f32 %v150_v13, %v119_v16  ;;  %131 = vst.msk [vmem:[#allocation3 + $0x8] sm:$0xff] %vm19_vm0, %v129_v15 }
  0xd9   :  { %130 = vst.msk [vmem:[#allocation3] sm:$0xff] %vm19_vm0, %v128_v17 }
  0xda   :  { %183 = shalt.err (!%p180_p4)
}
  0xdb   :  { %s196_s27 = smov 128   ;;  %s197_s2 = smov 8  }
  0xdc   :  { %143 = dma.vmem_to_hbm [thread:$0]  %s138_s0, 256, %s253_s3, [#allocation4], %s196_s27, %s196_s27, %s197_s2  }
  0xdd   :  { %192 = dma.done.wait [#allocation4], 256  }
  0xde   :  { %193 = vsyncadd [#allocation4], 4294967040 }
  0xdf   :  { %147 = vsyncpa [#allocation4], 1 }

// kernel: mha_forward.4
= control target key start
LH: loop header
LB: loop body
LE: loop exit
PB: predicated region body
PF: predicated region fallthrough
CT: control target
= control target key end

     0   :  { %s1432_s12 = smov 0   ;;  %s1434_s13 = smov 0   ;;  %s1588_s0 = inlined_call_operand.vmem [shape: f32[2,4,8,8], index: 0, kind: input, shape index: {}]   ;;  %s1589_s1 = inlined_call_operand.vmem [shape: f32[2,4,8,8], index: 1, kind: input, shape index: {}]   ;;  %s1590_s2 = inlined_call_operand.vmem [shape: f32[2,4,8,8], index: 2, kind: input, shape index: {}]   ;;  %s1591_s3 = inlined_call_operand.vmem [shape: f32[2,8,32], index: 3, kind: output, shape index: {}]  }
   0x1   :  { %s1436_s14 = smov 0  }
   0x2 LB: > { %s32_s15 = sadd.s32 1, %s1399_s13  ;;  %p1237_p0 = scmp.ge.s32.totalorder %s1403_s14, 1  ;;  %s1403_s14 = sphi %s1436_s14, %s13_s14   ;;  %s1399_s13 = sphi %s1434_s13, %s1593_s13   ;;  %s1395_s12 = sphi %s1432_s12, %s1592_s12  }
   0x3   : > { %p34_p1 = scmp.ge.s32.totalorder %s32_s15, 2  ;;  %p193_p2 = scmp.lt.s32.totalorder %s1403_s14, 3 }
   0x5   : > { %s1595_s15 = smov (%p34_p1, %s32_s15), 0  ;;  %p194_p3 = pnand %p1237_p0, %p193_p2 }
   0x6   : > { %p238_p4 = scmp.lt.s32.totalorder (!%p194_p3), %s1395_s12, 1  ;;  %s1409_s26 = smov (!%p194_p3), 8  }
   0x7   : > { %197 = sbr.rel (%p194_p3) target bundleno = 1396 (0x574), region = 32  ;;  %s1410_s27 = smov (!%p194_p3), 16  }
   0x8   : > { %s1411_s28 = smov (!%p194_p3), 24  }
   0xc   : > { %vm281_vm0 = vcmask 64512   ;;  %v1405_v0 = vmov 0.0   ;;  %vm1406_vm1 = vmmov 0   ;;  %s1597_s12 = smov (!%p238_p4, %s1395_s12), 1  ;;  %vm286_vm2 = vcmask 7168  }
   0xd   : > { %1284 = vmatprep.subr.mxu0 %v1405_v0  ;;  %295 = vst.msk [vmem:[#allocation5] sm:$0xff] %vm281_vm0, %v1405_v0  ;;  %296 = vst.msk [vmem:[#allocation5 + $0x8] sm:$0xff] %vm281_vm0, %v1405_v0  ;;  %1286 = vmatprep.mubr.msk.f32.mxu0 %vm1406_vm1, %v1405_v0  ;;  %s1467_s16 = sshll.u32 %s1597_s12, 5  ;;  %v1407_v11 = vmov -inf   ;;  %v1408_v15 = vmov 0   ;;  %s1244_s29 = sshll.u32 %s1597_s12, 3 }
   0xe   : > { %297 = vst.msk [vmem:[#allocation5 + $0x10] sm:$0xff] %vm281_vm0, %v1405_v0  ;;  %298 = vst.msk [vmem:[#allocation5 + $0x18] sm:$0xff] %vm281_vm0, %v1405_v0  ;;  %1289 = vmatprep.subr.mxu1 %v1405_v0  ;;  %1291 = vmatprep.mubr.msk.f32.mxu1 %vm1406_vm1, %v1405_v0  ;;  %s245_s19 = scalar_lea.vmem %s1588_s0, %s1467_s16  ;;  %s1477_s22 = scalar_lea.vmem %s1589_s1, %s1467_s16  ;;  %vm1111_vm3 = vcmask 130048   ;;  %vm1113_vm4 = vcmask 195584   ;;  %vm1115_vm5 = vcmask 261120  }
   0xf   : > { %v273_v1 = vld [vmem:[%s245_s19] sm:$0xff]  ;;  %v274_v2 = vld [vmem:[%s245_s19 + $0x8] sm:$0xff]  ;;  %v275_v3 = vld [vmem:[%s245_s19 + $0x10] sm:$0xff]  ;;  %287 = vst.msk [vmem:[#allocation3] sm:$0xff] %vm286_vm2, %v1407_v11  ;;  %1355 = vset.pattern.permute.xlu0 %v1408_v15  ;;  %1356 = vset.pattern.permute.xlu1 %v1408_v15  ;;  %s1516_s25 = scalar_lea.vmem %s1590_s2, %s1467_s16  ;;  %s268_s5 = scalar_lea.vmem %s1591_s3, %s1244_s29 }
  0x10   : > { %v276_v4 = vld [vmem:[%s245_s19 + $0x18] sm:$0xff]  ;;  %v277_v5 = vmul.f32 0.35355338, %v273_v1  ;;  %v278_v6 = vmul.f32 0.35355338, %v274_v2  ;;  %v300_v7 = vld [vmem:[%s1477_s22] sm:$0xff] }
  0x11   : > { %v279_v8 = vmul.f32 0.35355338, %v275_v3  ;;  %v280_v9 = vmul.f32 0.35355338, %v276_v4  ;;  %1285 = vmatpush3.xpose.msk.msra.mxu0 %vm281_vm0, %v300_v7  ;;  %288 = vst.msk [vmem:[#allocation3 + $0x8] sm:$0xff] %vm286_vm2, %v1407_v11  ;;  %289 = vst.msk [vmem:[#allocation3 + $0x10] sm:$0xff] %vm286_vm2, %v1407_v11 }
  0x12   : > { %282 = vst.msk [vmem:[#allocation2] sm:$0xff] %vm281_vm0, %v277_v5  ;;  %283 = vst.msk [vmem:[#allocation2 + $0x8] sm:$0xff] %vm281_vm0, %v278_v6  ;;  %1299 = vmatprep.subr.mxu0 %v1405_v0  ;;  %v409_v20 = vld [vmem:[%s1516_s25] sm:$0xff]  ;;  %v1248_v24 = vld [vmem:[%s1477_s22 + $0x8] sm:$0xff] }
  0x13   : > { %284 = vst.msk [vmem:[#allocation2 + $0x10] sm:$0xff] %vm281_vm0, %v279_v8  ;;  %285 = vst.msk [vmem:[#allocation2 + $0x18] sm:$0xff] %vm281_vm0, %v280_v9  ;;  %1290 = vmatpush3.msra.mxu1 %v409_v20  ;;  %v1253_v27 = vld [vmem:[%s1477_s22 + $0x10] sm:$0xff]  ;;  %v1258_v29 = vld [vmem:[%s1477_s22 + $0x18] sm:$0xff] }
  0x14   : > { %290 = vst.msk [vmem:[#allocation3 + $0x18] sm:$0xff] %vm286_vm2, %v1407_v11  ;;  %291 = vst.msk [vmem:[#allocation4] sm:$0xff] %vm286_vm2, %v1405_v0  ;;  %1294 = vmatprep.subr.mxu1 %v1405_v0  ;;  %v1251_v54 = vld [vmem:[%s1516_s25 + $0x8] sm:$0xff]  ;;  %v1256_v2 = vld [vmem:[%s1516_s25 + $0x10] sm:$0xff] }
  0x15   : > { %292 = vst.msk [vmem:[#allocation4 + $0x8] sm:$0xff] %vm286_vm2, %v1405_v0  ;;  %293 = vst.msk [vmem:[#allocation4 + $0x10] sm:$0xff] %vm286_vm2, %v1405_v0  ;;  %v1261_v5 = vld [vmem:[%s1516_s25 + $0x18] sm:$0xff] }
  0x16   : > { %294 = vst.msk [vmem:[#allocation4 + $0x18] sm:$0xff] %vm286_vm2, %v1405_v0  ;;  %v1502_v16 = vld [vmem:[#allocation3] sm:$0xff] }
  0x18   : > { %v567_v42 = vld [vmem:[#allocation3 + $0x8] sm:$0xff]  ;;  %v758_v45 = vld [vmem:[#allocation3 + $0x10] sm:$0xff] }
  0x19   : > { %v299_v10 = vld [vmem:[#allocation2] sm:$0xff]  ;;  %v487_v26 = vld [vmem:[#allocation2 + $0x8] sm:$0xff] }
  0x1a   : > { %1287 = vmatmul.mubr.msk.f32.vlgmr.msra.gmra.mxu0 %vm281_vm0, %v299_v10  ;;  %v678_v28 = vld [vmem:[#allocation2 + $0x10] sm:$0xff]  ;;  %v869_v30 = vld [vmem:[#allocation2 + $0x18] sm:$0xff] }
  0x1b   : > { %1301 = vmatprep.mubr.msk.f32.mxu0 %vm1406_vm1, %v1405_v0  ;;  %v949_v49 = vld [vmem:[#allocation3 + $0x18] sm:$0xff]  ;;  %1300 = vmatpush3.msra.mxu0 %v1251_v54 }
  0x1c   : > { %1309 = vmatprep.subr.mxu0 %v1405_v0 }
  0xda   : > { %v374_v12 = vpop.f32.mrf.mxu0 }
  0xdb   : > { %v379_v13 = vsel %vm281_vm0, %v374_v12, -inf }
  0xdc   : > { %380 = vmax.xlane.f32.xlu0 %v379_v13  ;;  %v1288_v14 = vpop.f32.mrf.mxu0 }
 0x165   : > { %v381_v17 = vpop.xlane.xlu0 %380 }
 0x166   : > { %v1505_v18 = vmax.f32 %v1502_v16, %v381_v17  ;;  %v394_v17 = vld [vmem:[#allocation4] sm:$0xff] }
 0x168   : > { %v383_v19 = vsub.f32 %v1502_v16, %v1505_v18  ;;  %485 = vst.msk [vmem:[#allocation3] sm:$0xff] %vm286_vm2, %v1505_v18  ;;  %388 = vperm.xlu0 %1355, %v1505_v18  }
 0x16a   : > { %v384_v8 = vmul.f32 1.442695, %v383_v19 }
 0x1e3   : > { %v389_v21 = vpop.permute.xlu0 %388 }
 0x1e4   : > { %v391_v22 = vsub.f32 %v374_v12, %v389_v21 }
 0x1e6   : > { %v392_v23 = vmul.f32 1.442695, %v391_v22  ;;  %v584_v22 = vld [vmem:[#allocation4 + $0x8] sm:$0xff] }
 0x1e8   : > { %1357 = vpow2.f32 %v392_v23 }
 0x1f5   : > { %v1358_v25 = vpop.eup %1357 }
 0x1f6   : > { %1292 = vmatmul.mubr.msk.f32.vlgmr.msra.gmra.mxu1 %vm281_vm0, %v1358_v25  ;;  %v396_v55 = vsel %vm281_vm0, %v1358_v25, 0.0  ;;  %v775_v25 = vld [vmem:[#allocation4 + $0x10] sm:$0xff] }
 0x1f7   : > { %1295 = vmatpush3.xpose.msk.msra.mxu1 %vm281_vm0, %v1248_v24  ;;  %1296 = vmatprep.mubr.msk.f32.mxu1 %vm1406_vm1, %v1405_v0 }
 0x1f8   : > { %1304 = vmatprep.subr.mxu1 %v1405_v0 }
 0x1fa   : > { %1297 = vmatmul.mubr.msk.f32.vlgmr.msra.gmra.mxu1 %vm281_vm0, %v487_v26 }
 0x1fb   : > { %1305 = vmatpush3.xpose.msk.msra.mxu1 %vm281_vm0, %v1253_v27  ;;  %1306 = vmatprep.mubr.msk.f32.mxu1 %vm1406_vm1, %v1405_v0 }
 0x1fc   : > { %1314 = vmatprep.subr.mxu1 %v1405_v0 }
 0x1fe   : > { %1307 = vmatmul.mubr.msk.f32.vlgmr.msra.gmra.mxu1 %vm281_vm0, %v678_v28 }
 0x1ff   : > { %1315 = vmatpush3.xpose.msk.msra.mxu1 %vm281_vm0, %v1258_v29  ;;  %1316 = vmatprep.mubr.msk.f32.mxu1 %vm1406_vm1, %v1405_v0  ;;  %v966_v29 = vld [vmem:[#allocation4 + $0x18] sm:$0xff] }
 0x202   : > { %1317 = vmatmul.mubr.msk.f32.vlgmr.msra.gmra.mxu1 %vm281_vm0, %v869_v30 }
 0x2b6   : > { %v1538_v31 = vpop.f32.mrf.mxu1 }
 0x2b8   : > { %v1293_v32 = vpop.f32.mrf.mxu1 }
 0x2b9   : > { %v402_v32 = vld [vmem:[#allocation5] sm:$0xff] }
 0x2ba   : > { %v562_v33 = vpop.f32.mrf.mxu1 }
 0x2bb   : > { %v568_v34 = vsel %vm281_vm0, %v562_v33, -inf }
 0x2bc   : > { %569 = vmax.xlane.f32.xlu1 %v568_v34  ;;  %v1298_v35 = vpop.f32.mrf.mxu1 }
 0x2be   : > { %v753_v36 = vpop.f32.mrf.mxu1 }
 0x2bf   : > { %v759_v37 = vsel %vm281_vm0, %v753_v36, -inf }
 0x2c0   : > { %760 = vmax.xlane.f32.xlu1 %v759_v37  ;;  %v1308_v38 = vpop.f32.mrf.mxu1 }
 0x2c2   : > { %v944_v39 = vpop.f32.mrf.mxu1 }
 0x2c3   : > { %v950_v40 = vsel %vm281_vm0, %v944_v39, -inf }
 0x2c4   : > { %951 = vmax.xlane.f32.xlu1 %v950_v40  ;;  %v1318_v41 = vpop.f32.mrf.mxu1 }
 0x345   : > { %v570_v43 = vpop.xlane.xlu1 %569 }
 0x346   : > { %v571_v44 = vmax.f32 %v567_v42, %v570_v43 }
 0x348   : > { %v572_v46 = vsub.f32 %v567_v42, %v571_v44  ;;  %676 = vst.msk [vmem:[#allocation3 + $0x8] sm:$0xff] %vm286_vm2, %v571_v44  ;;  %577 = vperm.xlu1 %1356, %v571_v44   ;;  %v592_v42 = vld [vmem:[#allocation5 + $0x8] sm:$0xff] }
 0x349   : > { %v761_v47 = vpop.xlane.xlu1 %760 }
 0x34a   : > { %v762_v48 = vmax.f32 %v758_v45, %v761_v47  ;;  %v573_v10 = vmul.f32 1.442695, %v572_v46 }
 0x34c   : > { %v763_v50 = vsub.f32 %v758_v45, %v762_v48  ;;  %867 = vst.msk [vmem:[#allocation3 + $0x10] sm:$0xff] %vm286_vm2, %v762_v48  ;;  %768 = vperm.xlu1 %1356, %v762_v48   ;;  %v783_v45 = vld [vmem:[#allocation5 + $0x10] sm:$0xff] }
 0x34d   : > { %v952_v51 = vpop.xlane.xlu1 %951 }
 0x34e   : > { %v953_v52 = vmax.f32 %v949_v49, %v952_v51  ;;  %v764_v12 = vmul.f32 1.442695, %v763_v50  ;;  %v974_v51 = vld [vmem:[#allocation5 + $0x18] sm:$0xff] }
 0x350   : > { %v954_v53 = vsub.f32 %v949_v49, %v953_v52  ;;  %1058 = vst.msk [vmem:[#allocation3 + $0x18] sm:$0xff] %vm286_vm2, %v953_v52  ;;  %959 = vperm.xlu1 %1356, %v953_v52  }
 0x352   : > { %v955_v13 = vmul.f32 1.442695, %v954_v53 }
 0x374   : > { %397 = vadd.xlane.f32.xlu1 %v396_v55 }
 0x3c3   : > { %v578_v56 = vpop.permute.xlu1 %577 }
 0x3c4   : > { %v580_v57 = vsub.f32 %v562_v33, %v578_v56 }
 0x3c6   : > { %v581_v58 = vmul.f32 1.442695, %v580_v57 }
 0x3c7   : > { %v769_v59 = vpop.permute.xlu1 %768 }
 0x3c8   : > { %1359 = vpow2.f32 %v581_v58  ;;  %v771_v60 = vsub.f32 %v753_v36, %v769_v59 }
 0x3ca   : > { %v772_v61 = vmul.f32 1.442695, %v771_v60 }
 0x3cb   : > { %v960_v62 = vpop.permute.xlu1 %959 }
 0x3cc   : > { %1361 = vpow2.f32 %v772_v61  ;;  %v962_v63 = vsub.f32 %v944_v39, %v960_v62 }
 0x3ce   : > { %v963_v1 = vmul.f32 1.442695, %v962_v63 }
 0x3d0   : > { %1363 = vpow2.f32 %v963_v1 }
 0x3d1   : > { %1365 = vpow2.f32 %v384_v8 }
 0x3d2   : > { %1367 = vpow2.f32 %v573_v10 }
 0x3d3   : > { %1369 = vpow2.f32 %v764_v12 }
 0x3d4   : > { %1371 = vpow2.f32 %v955_v13 }
 0x3d5   : > { %v1360_v3 = vpop.eup %1359 }
 0x3d6   : > { %1302 = vmatmul.mubr.msk.f32.vlgmr.msra.gmra.mxu0 %vm281_vm0, %v1360_v3  ;;  %v586_v4 = vsel %vm281_vm0, %v1360_v3, 0.0 }
 0x3d7   : > { %587 = vadd.xlane.f32.xlu0 %v586_v4  ;;  %1310 = vmatpush3.msra.mxu0 %v1256_v2 }
 0x3d8   : > { %1311 = vmatprep.mubr.msk.f32.mxu0 %vm1406_vm1, %v1405_v0  ;;  %1319 = vmatprep.subr.mxu0 %v1405_v0 }
 0x3d9   : > { %v1362_v6 = vpop.eup %1361 }
 0x3da   : > { %1312 = vmatmul.mubr.msk.f32.vlgmr.msra.gmra.mxu0 %vm281_vm0, %v1362_v6  ;;  %v777_v7 = vsel %vm281_vm0, %v1362_v6, 0.0 }
 0x3db   : > { %778 = vadd.xlane.f32.xlu1 %v777_v7  ;;  %1320 = vmatpush3.msra.mxu0 %v1261_v5 }
 0x3dc   : > { %1321 = vmatprep.mubr.msk.f32.mxu0 %vm1406_vm1, %v1405_v0 }
 0x3dd   : > { %v1364_v9 = vpop.eup %1363 }
 0x3de   : > { %1322 = vmatmul.mubr.msk.f32.vlgmr.msra.gmra.mxu0 %vm281_vm0, %v1364_v9  ;;  %v968_v11 = vsel %vm281_vm0, %v1364_v9, 0.0  ;;  %v1366_v14 = vpop.eup %1365 }
 0x3df   : > { %969 = vadd.xlane.f32.xlu1 %v968_v11  ;;  %v1368_v15 = vpop.eup %1367  ;;  %v395_v18 = vmul.f32 %v1366_v14, %v394_v17 }
 0x3e0   : > { %v1370_v16 = vpop.eup %1369  ;;  %v585_v23 = vmul.f32 %v1368_v15, %v584_v22 }
 0x3e1   : > { %v1372_v0 = vpop.eup %1371  ;;  %v776_v27 = vmul.f32 %v1370_v16, %v775_v25 }
 0x3e2   : > { %v967_v33 = vmul.f32 %v1372_v0, %v966_v29 }
 0x3ed   : > { %405 = vperm.xlu0 %1355, %v1366_v14  }
 0x3f0   : > { %595 = vperm.xlu1 %1356, %v1368_v15  }
 0x3f1   : > { %786 = vperm.xlu0 %1355, %v1370_v16  }
 0x3f4   : > { %977 = vperm.xlu1 %1356, %v1372_v0  }
 0x3fd   : > { %v398_v19 = vpop.xlane.xlu1 %397 }
 0x3fe   : > { %v399_v20 = vadd.f32 %v398_v19, %v395_v18 }
 0x400   : > { %401 = vst.msk [vmem:[#allocation4] sm:$0xff] %vm286_vm2, %v399_v20 }
 0x407   : > { %v1063_v21 = vld [vmem:[#allocation4] sm:$0xff] }
 0x408   : > { %1066 = vperm.xlu1 %1356, %v1063_v21  }
 0x460   : > { %v588_v24 = vpop.xlane.xlu0 %587 }
 0x461   : > { %v589_v26 = vadd.f32 %v588_v24, %v585_v23 }
 0x463   : > { %590 = vst.msk [vmem:[#allocation4 + $0x8] sm:$0xff] %vm286_vm2, %v589_v26 }
 0x464   : > { %v779_v28 = vpop.xlane.xlu1 %778 }
 0x465   : > { %v780_v30 = vadd.f32 %v779_v28, %v776_v27 }
 0x467   : > { %781 = vst.msk [vmem:[#allocation4 + $0x10] sm:$0xff] %vm286_vm2, %v780_v30 }
 0x468   : > { %v970_v34 = vpop.xlane.xlu1 %969  ;;  %v406_v35 = vpop.permute.xlu0 %405 }
 0x469   : > { %v971_v36 = vadd.f32 %v970_v34, %v967_v33  ;;  %v408_v37 = vmul.f32 %v406_v35, %v402_v32 }
 0x46a   : > { %v1072_v38 = vld [vmem:[#allocation4 + $0x8] sm:$0xff] }
 0x46b   : > { %972 = vst.msk [vmem:[#allocation4 + $0x18] sm:$0xff] %vm286_vm2, %v971_v36  ;;  %v483_v39 = vadd.f32 %v1538_v31, %v408_v37  ;;  %1075 = vperm.xlu0 %1355, %v1072_v38  }
 0x46c   : > { %v596_v43 = vpop.permute.xlu1 %595  ;;  %v787_v46 = vpop.permute.xlu0 %786 }
 0x46d   : > { %484 = vst.msk [vmem:[#allocation5] sm:$0xff] %vm281_vm0, %v483_v39  ;;  %v598_v44 = vmul.f32 %v596_v43, %v592_v42  ;;  %v789_v50 = vmul.f32 %v787_v46, %v783_v45 }
 0x46e   : > { %v1081_v40 = vld [vmem:[#allocation4 + $0x10] sm:$0xff] }
 0x46f   : > { %1084 = vperm.xlu1 %1356, %v1081_v40  }
 0x470   : > { %v978_v31 = vpop.permute.xlu1 %977 }
 0x471   : > { %v980_v55 = vmul.f32 %v978_v31, %v974_v51 }
 0x472   : > { %v1090_v41 = vld [vmem:[#allocation4 + $0x18] sm:$0xff] }
 0x473   : > { %1093 = vperm.xlu0 %1355, %v1090_v41  }
 0x474   : > { %v1062_v10 = vld [vmem:[#allocation5] sm:$0xff] }
 0x483   : > { %v1067_v59 = vpop.permute.xlu1 %1066 }
 0x496   : > { %v670_v47 = vpop.f32.mrf.mxu0 }
 0x497   : > { %v674_v48 = vadd.f32 %v670_v47, %v598_v44 }
 0x498   : > { %v1303_v49 = vpop.f32.mrf.mxu0 }
 0x499   : > { %675 = vst.msk [vmem:[#allocation5 + $0x8] sm:$0xff] %vm281_vm0, %v674_v48 }
 0x49a   : > { %v861_v52 = vpop.f32.mrf.mxu0 }
 0x49b   : > { %v865_v53 = vadd.f32 %v861_v52, %v789_v50 }
 0x49c   : > { %v1313_v54 = vpop.f32.mrf.mxu0 }
 0x49d   : > { %866 = vst.msk [vmem:[#allocation5 + $0x10] sm:$0xff] %vm281_vm0, %v865_v53 }
 0x49e   : > { %v1052_v56 = vpop.f32.mrf.mxu0 }
 0x49f   : > { %v1056_v57 = vadd.f32 %v1052_v56, %v980_v55 }
 0x4a0   : > { %v1323_v58 = vpop.f32.mrf.mxu0  ;;  %v1071_v1 = vld [vmem:[#allocation5 + $0x8] sm:$0xff] }
 0x4a1   : > { %1057 = vst.msk [vmem:[#allocation5 + $0x18] sm:$0xff] %vm281_vm0, %v1056_v57 }
 0x4a4   : > { %v1080_v4 = vld [vmem:[#allocation5 + $0x10] sm:$0xff] }
 0x4a8   : > { %v1089_v7 = vld [vmem:[#allocation5 + $0x18] sm:$0xff] }
 0x4e6   : > { %v1076_v60 = vpop.permute.xlu0 %1075 }
 0x4e7   : > { %1373 = vrcp.f32 %v1076_v60 }
 0x4ea   : > { %v1085_v61 = vpop.permute.xlu1 %1084 }
 0x4eb   : > { %1375 = vrcp.f32 %v1085_v61 }
 0x4ee   : > { %v1094_v62 = vpop.permute.xlu0 %1093 }
 0x4ef   : > { %1377 = vrcp.f32 %v1094_v62 }
 0x4f0   : > { %1379 = vrcp.f32 %v1067_v59 }
 0x4f4   : > { %v1374_v63 = vpop.eup %1373 }
 0x4f5   : > { %v1079_v2 = vmul.f32 %v1374_v63, %v1071_v1 }
 0x4f7   : > { %1099 = vrot.lane.b32.xlu1 %v1079_v2, %s1409_s26 }
 0x4f8   : > { %v1376_v3 = vpop.eup %1375 }
 0x4f9   : > { %v1088_v5 = vmul.f32 %v1376_v3, %v1080_v4 }
 0x4fb   : > { %1103 = vrot.lane.b32.xlu0 %v1088_v5, %s1410_s27 }
 0x4fc   : > { %v1378_v6 = vpop.eup %1377 }
 0x4fd   : > { %v1097_v8 = vmul.f32 %v1378_v6, %v1089_v7  ;;  %v1380_v9 = vpop.eup %1379 }
 0x4fe   : > { %v1070_v12 = vmul.f32 %v1380_v9, %v1062_v10 }
 0x4ff   : > { %1107 = vrot.lane.b32.xlu1 %v1097_v8, %s1411_s28 }
 0x569   : > { %v1100_v11 = vpop.permute.xlu1 %1099 }
 0x56a   : > { %v1110_v14 = vsel %vm281_vm0, %v1070_v12, %v1100_v11 }
 0x56d   : > { %v1104_v13 = vpop.permute.xlu0 %1103 }
 0x56e   : > { %v1112_v15 = vsel %vm1111_vm3, %v1110_v14, %v1104_v13 }
 0x571   : > { %v1108_v16 = vpop.permute.xlu1 %1107 }
 0x572   : > { %v1114_v0 = vsel %vm1113_vm4, %v1112_v15, %v1108_v16 }
 0x573   : > { %1116 = vst.msk [vmem:[%s268_s5] sm:$0xff] %vm1115_vm5, %v1114_v0 }
 0x574 PF: > { %s13_s14 = sadd.s32 1, %s1403_s14   ;;  %s1592_s12 = smov %s1399_s13 }
 0x575   : > { %p10_p5 = scmp.ge.s32.totalorder %s13_s14, 4   ;;  %s1593_s13 = smov %s1595_s15 }
 0x577   :  { %12 = sbr.rel (!%p10_p5) target bundleno = 2 (0x2), region = 94 }

</bundles_post_ra>
